<compile_context>
chip_gen: v6e
topology: v6e:2x2x1
jax: 0.10.0
libtpu: 0.0.40
codegen_flags: <defaults>
</compile_context>

<pallas_src>
import functools

import jax
import jax.numpy as jnp
from jax.experimental import pallas as pl
from jax.experimental.pallas import tpu as pltpu


def _down_conv_kernel(x_ref, w_ref, p_ref, m_ref, mt_ref, o_ref, *,
                      H, W, Wp, group_size, eps, neg_slope):
    # One grid step == one image of the batch.
    #   x_ref : (1, Cin, Lp)   bf16  flattened zero-padded image (+1 pad each end)
    #   w_ref : (9, Cout, Cin) bf16  conv tap kk = kh*3 + kw
    #   p_ref : (Cout, 3)      f32   columns = [bias, gamma, beta]
    #   m_ref : (Cout, G)      f32   channel->group membership
    #   mt_ref: (G, Cout)      f32   m^T
    #   o_ref : (1, Cout, L)   f32   "wide" rows of length Wp (2 junk cols / row)
    cin = x_ref.shape[1]
    cout = o_ref.shape[1]
    L = H * Wp                                           # wide spatial extent

    x = x_ref[0]                                         # (Cin, Lp) bf16
    # 3x3 conv as 9 shifted bf16 matmuls with f32 accumulation on the MXU.
    acc = jnp.zeros((cout, L), jnp.float32)
    for kh in range(3):
        for kw in range(3):
            off = kh * Wp + kw
            acc = acc + jnp.dot(w_ref[kh * 3 + kw], x[:, off:off + L],
                                preferred_element_type=jnp.float32)

    bias = p_ref[:, 0:1]
    gamma = p_ref[:, 1:2]
    beta = p_ref[:, 2:3]
    acc = acc + bias                                     # (Cout, L)

    # Columns c == 0 and c == Wp-1 of each wide row are junk (flattened halo);
    # exclude them from the GroupNorm statistics.
    col = jax.lax.broadcasted_iota(jnp.int32, (1, L), 1) % Wp
    valid = jnp.logical_and(col >= 1, col <= W)          # (1, L)
    accv = jnp.where(valid, acc, 0.0)

    # GroupNorm stats: per-channel sum / sum-of-squares (lane reductions), then
    # one matmul to reduce to groups and one to broadcast back to channels.
    ch_stats = jnp.concatenate(
        [jnp.sum(accv, axis=1, keepdims=True),
         jnp.sum(accv * accv, axis=1, keepdims=True)], axis=1)               # (Cout, 2)
    grp = jnp.dot(mt_ref[...], ch_stats, preferred_element_type=jnp.float32)  # (G, 2)
    cnt = float(H * W * group_size)
    mean = grp[:, 0:1] / cnt
    var = grp[:, 1:2] / cnt - mean * mean                # E[x^2]-E[x]^2 in f32
    inv = jax.lax.rsqrt(var + eps)
    grp_mi = jnp.concatenate([mean, inv], axis=1)                             # (G, 2)
    ch_mi = jnp.dot(m_ref[...], grp_mi, preferred_element_type=jnp.float32)   # (Cout, 2)
    mean_c = ch_mi[:, 0:1]
    inv_c = ch_mi[:, 1:2]

    # Fold the GroupNorm affine into a single per-channel scale/shift.
    scale = inv_c * gamma                                # (Cout, 1)
    shift = beta - mean_c * scale                        # (Cout, 1)
    y = acc * scale + shift
    y = jnp.where(y >= 0, y, neg_slope * y)              # LeakyReLU(0.2)
    o_ref[0] = y.astype(o_ref.dtype)


def down_conv(x_nchw, weight, bias, gamma, beta, *,
              num_groups=32, eps=1e-5, neg_slope=0.2):
    """Forward pass of down_conv. x_nchw: (N, Cin, H, W). Returns (N, Cout, H, W)."""
    N, Cin, H, W = x_nchw.shape
    Cout, Cin_w, KH, KW = weight.shape
    assert Cin == Cin_w and KH == 3 and KW == 3
    assert Cout % num_groups == 0
    gsz = Cout // num_groups
    Hp, Wp = H + 2, W + 2
    L = H * Wp                       # "wide" output spatial length per image
    Lp = Hp * Wp + 2                 # flattened padded input (+1 zero each end)

    # --- glue (single light pass, no im2col): pad, flatten spatial, cast bf16 ---
    xp = jnp.pad(x_nchw, ((0, 0), (0, 0), (1, 1), (1, 1)))          # (N,Cin,Hp,Wp)
    xf = jnp.pad(xp.reshape(N, Cin, Hp * Wp), ((0, 0), (0, 0), (1, 1)))
    xf = xf.astype(jnp.bfloat16)                                    # (N,Cin,Lp)

    # Weight taps: (Cout, Cin, 3, 3) -> (9, Cout, Cin), tap kk = kh*3 + kw.
    w9 = jnp.transpose(weight, (2, 3, 0, 1)).reshape(9, Cout, Cin).astype(jnp.bfloat16)
    # Per-channel params stacked as columns: [bias, gamma, beta], f32.
    params = jnp.stack([bias, gamma, beta], axis=1).astype(jnp.float32)   # (Cout, 3)
    # Channel->group membership matrix and its transpose (f32, tiny).
    m = jnp.kron(jnp.eye(num_groups, dtype=jnp.float32),
                 jnp.ones((gsz, 1), dtype=jnp.float32))              # (Cout, G)
    mt = m.T                                                         # (G, Cout)

    kernel = functools.partial(_down_conv_kernel, H=H, W=W, Wp=Wp,
                               group_size=gsz, eps=eps, neg_slope=neg_slope)
    out_wide = pl.pallas_call(
        kernel,
        out_shape=jax.ShapeDtypeStruct((N, Cout, L), jnp.float32),
        grid_spec=pltpu.PrefetchScalarGridSpec(
            num_scalar_prefetch=0,
            grid=(N,),
            in_specs=[
                pl.BlockSpec((1, Cin, Lp), lambda n: (n, 0, 0)),
                pl.BlockSpec((9, Cout, Cin), lambda n: (0, 0, 0)),
                pl.BlockSpec((Cout, 3), lambda n: (0, 0)),
                pl.BlockSpec((Cout, num_groups), lambda n: (0, 0)),
                pl.BlockSpec((num_groups, Cout), lambda n: (0, 0)),
            ],
            out_specs=pl.BlockSpec((1, Cout, L), lambda n: (n, 0, 0)),
        ),
        compiler_params=pltpu.CompilerParams(
            dimension_semantics=("parallel",),
            vmem_limit_bytes=32 * 1024 * 1024,
        ),
    )(xf, w9, params, m, mt)

    # Wide rows carry 2 junk columns each; drop them -> NCHW directly (no transpose).
    return out_wide.reshape(N, Cout, H, Wp)[:, :, :, 1:W + 1]


def _reference(x, weight, bias, gamma, beta, num_groups=32, eps=1e-5,
               neg_slope=0.2, conv_dtype=jnp.float32):
    y = jax.lax.conv_general_dilated(
        x.astype(conv_dtype), weight.astype(conv_dtype),
        window_strides=(1, 1), padding=((1, 1), (1, 1)),
        dimension_numbers=("NCHW", "OIHW", "NCHW"),
        preferred_element_type=jnp.float32)
    y = y + bias.reshape(1, -1, 1, 1)
    N, C, H, W = y.shape
    yg = y.reshape(N, num_groups, C // num_groups, H, W)
    mean = yg.mean(axis=(2, 3, 4), keepdims=True)
    var = yg.var(axis=(2, 3, 4), keepdims=True)
    yn = ((yg - mean) / jnp.sqrt(var + eps)).reshape(N, C, H, W)
    yn = yn * gamma.reshape(1, -1, 1, 1) + beta.reshape(1, -1, 1, 1)
    return jnp.where(yn >= 0, yn, neg_slope * yn)


if __name__ == "__main__":
    # Small shapes consistent with the module: GroupNorm(32, out_ch) => out_ch = 32.
    N, Cin, H, W = 2, 4, 16, 16
    Cout = 32

    key = jax.random.PRNGKey(0)
    kx, kw, kb, kg, kbe = jax.random.split(key, 5)
    x = jax.random.normal(kx, (N, Cin, H, W), dtype=jnp.float32)
    weight = jax.random.normal(kw, (Cout, Cin, 3, 3), dtype=jnp.float32) * 0.1
    bias = jax.random.normal(kb, (Cout,), dtype=jnp.float32) * 0.1
    gamma = 1.0 + 0.1 * jax.random.normal(kg, (Cout,), dtype=jnp.float32)
    beta = 0.1 * jax.random.normal(kbe, (Cout,), dtype=jnp.float32)

    out = jax.block_until_ready(down_conv(x, weight, bias, gamma, beta))
    assert out.shape == (N, Cout, H, W)

    # Precision-matched reference: conv operands in bf16, same as the kernel's MXU path.
    ref_bf16 = _reference(x, weight, bias, gamma, beta, conv_dtype=jnp.bfloat16)
    err = float(jnp.max(jnp.abs(out - ref_bf16)))
    assert jnp.allclose(out, ref_bf16, atol=2e-3, rtol=2e-3), err

    # Loose sanity check vs the full-f32 reference (difference = bf16 MXU rounding only).
    ref_f32 = _reference(x, weight, bias, gamma, beta, conv_dtype=jnp.float32)
    err32 = float(jnp.max(jnp.abs(out - ref_f32)))
    assert jnp.allclose(out, ref_f32, atol=3e-2, rtol=3e-2), err32

    print("KERNEL_OK")
</pallas_src>

<mosaic_0001>
module attributes {stable_mosaic.version = 11 : i64} {
  func.func @_down_conv_kernel(%arg0: i32, %arg1: memref<1x4x326xbf16, #tpu.memory_space<vmem>>, %arg2: memref<9x32x4xbf16, #tpu.memory_space<vmem>>, %arg3: memref<32x3xf32, #tpu.memory_space<vmem>>, %arg4: memref<32x32xf32, #tpu.memory_space<vmem>>, %arg5: memref<32x32xf32, #tpu.memory_space<vmem>>, %arg6: memref<1x32x288xf32, #tpu.memory_space<vmem>>) attributes {dimension_semantics = [#tpu.dimension_semantics<parallel>], iteration_bounds = array<i64: 2>, scalar_prefetch = 0 : i64, scratch_operands = 0 : i64, tpu.core_type = #tpu.core_type<tc>, window_params = [{transform_indices = @transform_0, window_bounds = array<i64: 1, 4, 326>}, {pipeline_mode = #tpu.pipeline_mode<synchronous>, transform_indices = @transform_1, window_bounds = array<i64: 9, 32, 4>}, {pipeline_mode = #tpu.pipeline_mode<synchronous>, transform_indices = @transform_2, window_bounds = array<i64: 32, 3>}, {pipeline_mode = #tpu.pipeline_mode<synchronous>, transform_indices = @transform_3, window_bounds = array<i64: 32, 32>}, {pipeline_mode = #tpu.pipeline_mode<synchronous>, transform_indices = @transform_4, window_bounds = array<i64: 32, 32>}, {transform_indices = @transform_5, window_bounds = array<i64: 1, 32, 288>}]} {
    %c0 = arith.constant 0 : index
    %c0_0 = arith.constant 0 : index
    %c0_1 = arith.constant 0 : index
    %0 = vector.load %arg1[%c0, %c0_0, %c0_1] : memref<1x4x326xbf16, #tpu.memory_space<vmem>>, vector<1x4x326xbf16>
    %1 = vector.shape_cast %0 : vector<1x4x326xbf16> to vector<4x326xbf16>
    %cst = arith.constant 0.000000e+00 : f32
    %2 = vector.broadcast %cst : f32 to vector<32x288xf32>
    %c0_2 = arith.constant 0 : index
    %c0_3 = arith.constant 0 : index
    %c0_4 = arith.constant 0 : index
    %3 = vector.load %arg2[%c0_2, %c0_3, %c0_4] : memref<9x32x4xbf16, #tpu.memory_space<vmem>>, vector<1x32x4xbf16>
    %4 = vector.shape_cast %3 : vector<1x32x4xbf16> to vector<32x4xbf16>
    %5 = vector.extract_strided_slice %1 {offsets = [0, 0], sizes = [4, 288], strides = [1, 1]} : vector<4x326xbf16> to vector<4x288xbf16>
    %cst_5 = arith.constant dense<0.000000e+00> : vector<32x288xf32>
    %6 = tpu.matmul %4, %5, %cst_5 {dimension_numbers = #tpu.dot_dimension_numbers<[1], [0], [0], [1], [0, 0, 1, 1], [], []>} : vector<32x4xbf16>, vector<4x288xbf16>, vector<32x288xf32> -> vector<32x288xf32>
    %7 = arith.addf %2, %6 : vector<32x288xf32>
    %c1 = arith.constant 1 : index
    %c0_6 = arith.constant 0 : index
    %c0_7 = arith.constant 0 : index
    %8 = vector.load %arg2[%c1, %c0_6, %c0_7] : memref<9x32x4xbf16, #tpu.memory_space<vmem>>, vector<1x32x4xbf16>
    %9 = vector.shape_cast %8 : vector<1x32x4xbf16> to vector<32x4xbf16>
    %10 = vector.extract_strided_slice %1 {offsets = [0, 1], sizes = [4, 288], strides = [1, 1]} : vector<4x326xbf16> to vector<4x288xbf16>
    %cst_8 = arith.constant dense<0.000000e+00> : vector<32x288xf32>
    %11 = tpu.matmul %9, %10, %cst_8 {dimension_numbers = #tpu.dot_dimension_numbers<[1], [0], [0], [1], [0, 0, 1, 1], [], []>} : vector<32x4xbf16>, vector<4x288xbf16>, vector<32x288xf32> -> vector<32x288xf32>
    %12 = arith.addf %7, %11 : vector<32x288xf32>
    %c2 = arith.constant 2 : index
    %c0_9 = arith.constant 0 : index
    %c0_10 = arith.constant 0 : index
    %13 = vector.load %arg2[%c2, %c0_9, %c0_10] : memref<9x32x4xbf16, #tpu.memory_space<vmem>>, vector<1x32x4xbf16>
    %14 = vector.shape_cast %13 : vector<1x32x4xbf16> to vector<32x4xbf16>
    %15 = vector.extract_strided_slice %1 {offsets = [0, 2], sizes = [4, 288], strides = [1, 1]} : vector<4x326xbf16> to vector<4x288xbf16>
    %cst_11 = arith.constant dense<0.000000e+00> : vector<32x288xf32>
    %16 = tpu.matmul %14, %15, %cst_11 {dimension_numbers = #tpu.dot_dimension_numbers<[1], [0], [0], [1], [0, 0, 1, 1], [], []>} : vector<32x4xbf16>, vector<4x288xbf16>, vector<32x288xf32> -> vector<32x288xf32>
    %17 = arith.addf %12, %16 : vector<32x288xf32>
    %c3 = arith.constant 3 : index
    %c0_12 = arith.constant 0 : index
    %c0_13 = arith.constant 0 : index
    %18 = vector.load %arg2[%c3, %c0_12, %c0_13] : memref<9x32x4xbf16, #tpu.memory_space<vmem>>, vector<1x32x4xbf16>
    %19 = vector.shape_cast %18 : vector<1x32x4xbf16> to vector<32x4xbf16>
    %20 = vector.extract_strided_slice %1 {offsets = [0, 18], sizes = [4, 288], strides = [1, 1]} : vector<4x326xbf16> to vector<4x288xbf16>
    %cst_14 = arith.constant dense<0.000000e+00> : vector<32x288xf32>
    %21 = tpu.matmul %19, %20, %cst_14 {dimension_numbers = #tpu.dot_dimension_numbers<[1], [0], [0], [1], [0, 0, 1, 1], [], []>} : vector<32x4xbf16>, vector<4x288xbf16>, vector<32x288xf32> -> vector<32x288xf32>
    %22 = arith.addf %17, %21 : vector<32x288xf32>
    %c4 = arith.constant 4 : index
    %c0_15 = arith.constant 0 : index
    %c0_16 = arith.constant 0 : index
    %23 = vector.load %arg2[%c4, %c0_15, %c0_16] : memref<9x32x4xbf16, #tpu.memory_space<vmem>>, vector<1x32x4xbf16>
    %24 = vector.shape_cast %23 : vector<1x32x4xbf16> to vector<32x4xbf16>
    %25 = vector.extract_strided_slice %1 {offsets = [0, 19], sizes = [4, 288], strides = [1, 1]} : vector<4x326xbf16> to vector<4x288xbf16>
    %cst_17 = arith.constant dense<0.000000e+00> : vector<32x288xf32>
    %26 = tpu.matmul %24, %25, %cst_17 {dimension_numbers = #tpu.dot_dimension_numbers<[1], [0], [0], [1], [0, 0, 1, 1], [], []>} : vector<32x4xbf16>, vector<4x288xbf16>, vector<32x288xf32> -> vector<32x288xf32>
    %27 = arith.addf %22, %26 : vector<32x288xf32>
    %c5 = arith.constant 5 : index
    %c0_18 = arith.constant 0 : index
    %c0_19 = arith.constant 0 : index
    %28 = vector.load %arg2[%c5, %c0_18, %c0_19] : memref<9x32x4xbf16, #tpu.memory_space<vmem>>, vector<1x32x4xbf16>
    %29 = vector.shape_cast %28 : vector<1x32x4xbf16> to vector<32x4xbf16>
    %30 = vector.extract_strided_slice %1 {offsets = [0, 20], sizes = [4, 288], strides = [1, 1]} : vector<4x326xbf16> to vector<4x288xbf16>
    %cst_20 = arith.constant dense<0.000000e+00> : vector<32x288xf32>
    %31 = tpu.matmul %29, %30, %cst_20 {dimension_numbers = #tpu.dot_dimension_numbers<[1], [0], [0], [1], [0, 0, 1, 1], [], []>} : vector<32x4xbf16>, vector<4x288xbf16>, vector<32x288xf32> -> vector<32x288xf32>
    %32 = arith.addf %27, %31 : vector<32x288xf32>
    %c6 = arith.constant 6 : index
    %c0_21 = arith.constant 0 : index
    %c0_22 = arith.constant 0 : index
    %33 = vector.load %arg2[%c6, %c0_21, %c0_22] : memref<9x32x4xbf16, #tpu.memory_space<vmem>>, vector<1x32x4xbf16>
    %34 = vector.shape_cast %33 : vector<1x32x4xbf16> to vector<32x4xbf16>
    %35 = vector.extract_strided_slice %1 {offsets = [0, 36], sizes = [4, 288], strides = [1, 1]} : vector<4x326xbf16> to vector<4x288xbf16>
    %cst_23 = arith.constant dense<0.000000e+00> : vector<32x288xf32>
    %36 = tpu.matmul %34, %35, %cst_23 {dimension_numbers = #tpu.dot_dimension_numbers<[1], [0], [0], [1], [0, 0, 1, 1], [], []>} : vector<32x4xbf16>, vector<4x288xbf16>, vector<32x288xf32> -> vector<32x288xf32>
    %37 = arith.addf %32, %36 : vector<32x288xf32>
    %c7 = arith.constant 7 : index
    %c0_24 = arith.constant 0 : index
    %c0_25 = arith.constant 0 : index
    %38 = vector.load %arg2[%c7, %c0_24, %c0_25] : memref<9x32x4xbf16, #tpu.memory_space<vmem>>, vector<1x32x4xbf16>
    %39 = vector.shape_cast %38 : vector<1x32x4xbf16> to vector<32x4xbf16>
    %40 = vector.extract_strided_slice %1 {offsets = [0, 37], sizes = [4, 288], strides = [1, 1]} : vector<4x326xbf16> to vector<4x288xbf16>
    %cst_26 = arith.constant dense<0.000000e+00> : vector<32x288xf32>
    %41 = tpu.matmul %39, %40, %cst_26 {dimension_numbers = #tpu.dot_dimension_numbers<[1], [0], [0], [1], [0, 0, 1, 1], [], []>} : vector<32x4xbf16>, vector<4x288xbf16>, vector<32x288xf32> -> vector<32x288xf32>
    %42 = arith.addf %37, %41 : vector<32x288xf32>
    %c8 = arith.constant 8 : index
    %c0_27 = arith.constant 0 : index
    %c0_28 = arith.constant 0 : index
    %43 = vector.load %arg2[%c8, %c0_27, %c0_28] : memref<9x32x4xbf16, #tpu.memory_space<vmem>>, vector<1x32x4xbf16>
    %44 = vector.shape_cast %43 : vector<1x32x4xbf16> to vector<32x4xbf16>
    %45 = vector.extract_strided_slice %1 {offsets = [0, 38], sizes = [4, 288], strides = [1, 1]} : vector<4x326xbf16> to vector<4x288xbf16>
    %cst_29 = arith.constant dense<0.000000e+00> : vector<32x288xf32>
    %46 = tpu.matmul %44, %45, %cst_29 {dimension_numbers = #tpu.dot_dimension_numbers<[1], [0], [0], [1], [0, 0, 1, 1], [], []>} : vector<32x4xbf16>, vector<4x288xbf16>, vector<32x288xf32> -> vector<32x288xf32>
    %47 = arith.addf %42, %46 : vector<32x288xf32>
    %c0_30 = arith.constant 0 : index
    %c0_31 = arith.constant 0 : index
    %48 = vector.load %arg3[%c0_30, %c0_31] : memref<32x3xf32, #tpu.memory_space<vmem>>, vector<32x1xf32>
    %c0_32 = arith.constant 0 : index
    %c1_33 = arith.constant 1 : index
    %49 = vector.load %arg3[%c0_32, %c1_33] : memref<32x3xf32, #tpu.memory_space<vmem>>, vector<32x1xf32>
    %c0_34 = arith.constant 0 : index
    %c2_35 = arith.constant 2 : index
    %50 = vector.load %arg3[%c0_34, %c2_35] : memref<32x3xf32, #tpu.memory_space<vmem>>, vector<32x1xf32>
    %51 = vector.broadcast %48 : vector<32x1xf32> to vector<32x288xf32>
    %52 = arith.addf %47, %51 : vector<32x288xf32>
    %53 = tpu.iota {dimensions = array<i32: 1>} : vector<1x288xi32>
    %c18_i32 = arith.constant 18 : i32
    %c0_i32 = arith.constant 0 : i32
    %54 = arith.cmpi eq, %c18_i32, %c0_i32 : i32
    %c1_i32 = arith.constant 1 : i32
    %55 = arith.select %54, %c1_i32, %c18_i32 : i32
    %56 = vector.broadcast %55 : i32 to vector<1x288xi32>
    %57 = arith.remsi %53, %56 : vector<1x288xi32>
    %c0_i32_36 = arith.constant 0 : i32
    %58 = vector.broadcast %c0_i32_36 : i32 to vector<1x288xi32>
    %59 = arith.cmpi ne, %57, %58 : vector<1x288xi32>
    %c0_i32_37 = arith.constant 0 : i32
    %60 = vector.broadcast %c0_i32_37 : i32 to vector<1x288xi32>
    %61 = arith.cmpi slt, %57, %60 : vector<1x288xi32>
    %c0_i32_38 = arith.constant 0 : i32
    %62 = arith.cmpi slt, %55, %c0_i32_38 : i32
    %63 = vector.broadcast %62 : i1 to vector<1x288xi1>
    %64 = vector.broadcast %63 : vector<1x288xi1> to vector<1x288xi1>
    %65 = arith.xori %61, %64 : vector<1x288xi1>
    %66 = arith.andi %65, %59 : vector<1x288xi1>
    %67 = vector.broadcast %55 : i32 to vector<1x288xi32>
    %68 = arith.addi %57, %67 : vector<1x288xi32>
    %69 = arith.select %66, %68, %57 : vector<1x288xi1>, vector<1x288xi32>
    %c1_i32_39 = arith.constant 1 : i32
    %70 = vector.broadcast %c1_i32_39 : i32 to vector<1x288xi32>
    %71 = arith.cmpi sge, %69, %70 : vector<1x288xi32>
    %c16_i32 = arith.constant 16 : i32
    %72 = vector.broadcast %c16_i32 : i32 to vector<1x288xi32>
    %73 = arith.cmpi sle, %69, %72 : vector<1x288xi32>
    %74 = arith.andi %71, %73 : vector<1x288xi1>
    %cst_40 = arith.constant 0.000000e+00 : f32
    %75 = vector.shape_cast %74 : vector<1x288xi1> to vector<1x288xi1>
    %76 = vector.broadcast %75 : vector<1x288xi1> to vector<32x288xi1>
    %77 = vector.broadcast %cst_40 : f32 to vector<32x288xf32>
    %78 = arith.select %76, %52, %77 : vector<32x288xi1>, vector<32x288xf32>
    %cst_41 = arith.constant dense<0.000000e+00> : vector<32xf32>
    %79 = vector.multi_reduction <add>, %78, %cst_41 [1] : vector<32x288xf32> to vector<32xf32>
    %80 = vector.shape_cast %79 : vector<32xf32> to vector<32x1xf32>
    %81 = arith.mulf %78, %78 : vector<32x288xf32>
    %cst_42 = arith.constant dense<0.000000e+00> : vector<32xf32>
    %82 = vector.multi_reduction <add>, %81, %cst_42 [1] : vector<32x288xf32> to vector<32xf32>
    %83 = vector.shape_cast %82 : vector<32xf32> to vector<32x1xf32>
    %84 = tpu.concatenate %80, %83 in 1 : vector<32x1xf32>, vector<32x1xf32> -> vector<32x2xf32>
    %c0_43 = arith.constant 0 : index
    %c0_44 = arith.constant 0 : index
    %85 = vector.load %arg5[%c0_43, %c0_44] : memref<32x32xf32, #tpu.memory_space<vmem>>, vector<32x32xf32>
    %cst_45 = arith.constant dense<0.000000e+00> : vector<32x2xf32>
    %86 = tpu.matmul %85, %84, %cst_45 {dimension_numbers = #tpu.dot_dimension_numbers<[1], [0], [0], [1], [0, 0, 1, 1], [], []>} : vector<32x32xf32>, vector<32x2xf32>, vector<32x2xf32> -> vector<32x2xf32>
    %87 = vector.extract_strided_slice %86 {offsets = [0, 0], sizes = [32, 1], strides = [1, 1]} : vector<32x2xf32> to vector<32x1xf32>
    %cst_46 = arith.constant 2.560000e+02 : f32
    %88 = vector.broadcast %cst_46 : f32 to vector<32x1xf32>
    %89 = arith.divf %87, %88 : vector<32x1xf32>
    %90 = vector.extract_strided_slice %86 {offsets = [0, 1], sizes = [32, 1], strides = [1, 1]} : vector<32x2xf32> to vector<32x1xf32>
    %cst_47 = arith.constant 2.560000e+02 : f32
    %91 = vector.broadcast %cst_47 : f32 to vector<32x1xf32>
    %92 = arith.divf %90, %91 : vector<32x1xf32>
    %93 = arith.mulf %89, %89 : vector<32x1xf32>
    %94 = arith.subf %92, %93 : vector<32x1xf32>
    %cst_48 = arith.constant 9.99999974E-6 : f32
    %95 = vector.broadcast %cst_48 : f32 to vector<32x1xf32>
    %96 = arith.addf %94, %95 : vector<32x1xf32>
    %97 = math.rsqrt %96 : vector<32x1xf32>
    %98 = tpu.concatenate %89, %97 in 1 : vector<32x1xf32>, vector<32x1xf32> -> vector<32x2xf32>
    %c0_49 = arith.constant 0 : index
    %c0_50 = arith.constant 0 : index
    %99 = vector.load %arg4[%c0_49, %c0_50] : memref<32x32xf32, #tpu.memory_space<vmem>>, vector<32x32xf32>
    %cst_51 = arith.constant dense<0.000000e+00> : vector<32x2xf32>
    %100 = tpu.matmul %99, %98, %cst_51 {dimension_numbers = #tpu.dot_dimension_numbers<[1], [0], [0], [1], [0, 0, 1, 1], [], []>} : vector<32x32xf32>, vector<32x2xf32>, vector<32x2xf32> -> vector<32x2xf32>
    %101 = vector.extract_strided_slice %100 {offsets = [0, 0], sizes = [32, 1], strides = [1, 1]} : vector<32x2xf32> to vector<32x1xf32>
    %102 = vector.extract_strided_slice %100 {offsets = [0, 1], sizes = [32, 1], strides = [1, 1]} : vector<32x2xf32> to vector<32x1xf32>
    %103 = arith.mulf %102, %49 : vector<32x1xf32>
    %104 = arith.mulf %101, %103 : vector<32x1xf32>
    %105 = arith.subf %50, %104 : vector<32x1xf32>
    %106 = vector.broadcast %103 : vector<32x1xf32> to vector<32x288xf32>
    %107 = arith.mulf %52, %106 : vector<32x288xf32>
    %108 = vector.broadcast %105 : vector<32x1xf32> to vector<32x288xf32>
    %109 = arith.addf %107, %108 : vector<32x288xf32>
    %cst_52 = arith.constant 0.000000e+00 : f32
    %110 = vector.broadcast %cst_52 : f32 to vector<32x288xf32>
    %111 = arith.cmpf oge, %109, %110 : vector<32x288xf32>
    %cst_53 = arith.constant 2.000000e-01 : f32
    %112 = vector.broadcast %cst_53 : f32 to vector<32x288xf32>
    %113 = arith.mulf %112, %109 : vector<32x288xf32>
    %114 = arith.select %111, %109, %113 : vector<32x288xi1>, vector<32x288xf32>
    %c0_54 = arith.constant 0 : index
    %c0_55 = arith.constant 0 : index
    %c0_56 = arith.constant 0 : index
    %115 = vector.load %arg6[%c0_54, %c0_55, %c0_56] : memref<1x32x288xf32, #tpu.memory_space<vmem>>, vector<1x32x288xf32>
    %116 = vector.shape_cast %115 : vector<1x32x288xf32> to vector<32x288xf32>
    %117 = vector.shape_cast %114 : vector<32x288xf32> to vector<1x32x288xf32>
    tpu.vector_store %arg6[%c0_54, %c0_55, %c0_56], %117 {strides = array<i32>} : memref<1x32x288xf32, #tpu.memory_space<vmem>>, vector<1x32x288xf32>,
    return
  }
  func.func @transform_0(%arg0: i32) -> (i32, i32, i32) {
    %c0_i32 = arith.constant 0 : i32
    %c0_i32_0 = arith.constant 0 : i32
    %c0_i32_1 = arith.constant 0 : i32
    return %arg0, %c0_i32, %c0_i32_0 : i32, i32, i32
  }
  func.func @transform_1(%arg0: i32) -> (i32, i32, i32) {
    %c0_i32 = arith.constant 0 : i32
    %c0_i32_0 = arith.constant 0 : i32
    %c0_i32_1 = arith.constant 0 : i32
    %c0_i32_2 = arith.constant 0 : i32
    return %c0_i32, %c0_i32_0, %c0_i32_1 : i32, i32, i32
  }
  func.func @transform_2(%arg0: i32) -> (i32, i32) {
    %c0_i32 = arith.constant 0 : i32
    %c0_i32_0 = arith.constant 0 : i32
    %c0_i32_1 = arith.constant 0 : i32
    return %c0_i32, %c0_i32_0 : i32, i32
  }
  func.func @transform_3(%arg0: i32) -> (i32, i32) {
    %c0_i32 = arith.constant 0 : i32
    %c0_i32_0 = arith.constant 0 : i32
    %c0_i32_1 = arith.constant 0 : i32
    return %c0_i32, %c0_i32_0 : i32, i32
  }
  func.func @transform_4(%arg0: i32) -> (i32, i32) {
    %c0_i32 = arith.constant 0 : i32
    %c0_i32_0 = arith.constant 0 : i32
    %c0_i32_1 = arith.constant 0 : i32
    return %c0_i32, %c0_i32_0 : i32, i32
  }
  func.func @transform_5(%arg0: i32) -> (i32, i32, i32) {
    %c0_i32 = arith.constant 0 : i32
    %c0_i32_0 = arith.constant 0 : i32
    %c0_i32_1 = arith.constant 0 : i32
    return %arg0, %c0_i32, %c0_i32_0 : i32, i32, i32
  }
}

</mosaic_0001>

<bundles_post_ra>
// kernel: tpu_custom_call.1
= control target key start
LH: loop header
LB: loop body
LE: loop exit
PB: predicated region body
PF: predicated region fallthrough
CT: control target
= control target key end

     0   :  { %10 = vsyncpa [#allocation3], 0  ;;  %s3429_s0 = inlined_call_operand.vmem [shape: bf16[2,4,326], index: 0, kind: input, shape index: {}]   ;;  %s3430_s1 = inlined_call_operand.vmem [shape: bf16[9,32,4], index: 1, kind: input, shape index: {}]   ;;  %s3431_s2 = inlined_call_operand.vmem [shape: f32[32,3], index: 2, kind: input, shape index: {}]   ;;  %s3432_s3 = inlined_call_operand.vmem [shape: f32[32,32], index: 3, kind: input, shape index: {}]   ;;  %s3433_s4 = inlined_call_operand.vmem [shape: f32[32,32], index: 4, kind: input, shape index: {}]   ;;  %s3434_s5 = inlined_call_operand.hbm [shape: f32[2,32,288], index: 5, kind: output, shape index: {}]  }
   0x1   :  { %12 = vsyncpa [#allocation3 + $0x1], 0  ;;  %s2694_s18 = smov 0   ;;  %s2696_s19 = smov 0  }
   0x2   :  { %s2698_s20 = smov 0   ;;  %s2700_s21 = smov 0  }
   0x3 LB: > { %s2715_s22 = sadd.s32 4294967295, %s2645_s21   ;;  %s2231_s23 = sadd.s32 4294967294, %s2645_s21   ;;  %s2645_s21 = sphi %s2700_s21, %s3492_s21   ;;  %s2641_s20 = sphi %s2698_s20, %s3491_s20   ;;  %s2637_s19 = sphi %s2696_s19, %s3490_s19   ;;  %s2633_s18 = sphi %s2694_s18, %s3489_s18  }
   0x4   : > { %s2719_s24 = sadd.s32 1, %s2645_s21   ;;  %s135_s25 = sadd.s32 1, %s2641_s20 }
   0x5   : > { %s132_s26 = ssub.s32 %s2645_s21, %s2719_s24  ;;  %p145_p0 = scmp.ne.s32.totalorder %s2641_s20, %s2637_s19 }
   0x6   : > { %p133_p1 = scmp.eq.s32.totalorder %s132_s26, 0  ;;  %p146_p2 = scmp.eq.s32.totalorder %s2715_s22, 1 }
   0x7   : > { %p151_p3 = scmp.ne.s32.totalorder %s2637_s19, %s2633_s18  ;;  %p152_p4 = scmp.eq.s32.totalorder %s2231_s23, 1 }
   0x8   : > { %s2730_s27 = scalar_select %p133_p1, %s2641_s20, %s135_s25  }
   0x9   : > { %p2732_p5 = por %p146_p2, %p145_p0  ;;  %p2736_p6 = por %p152_p4, %p151_p3 }
   0xa   : > { %p2234_p7 = scmp.ge.s32.totalorder %s2645_s21, 1  ;;  %p190_p8 = scmp.lt.s32.totalorder %s2645_s21, 3 }
   0xc   : > { %p191_p9 = pnand %p2234_p7, %p190_p8 }
   0xe   : > { %194 = sbr.rel (%p191_p9) target bundleno = 1544 (0x608), region = 40 }
  0x13   : > { %p218_p10 = scmp.lt.s32.totalorder %s2715_s22, 1  ;;  %v249_v0 = vlaneseq  ;;  %v2647_v1 = vmov 1983009808   ;;  %v2748_v4 = vld [vmem:[%s3430_s1 + $0x10] sm:$0xff]   ;;  %vm270_vm0 = vcmask 31744   ;;  %v2648_v6 = vmov 0  }
  0x14   : > { %v247_v2 = vunpack.c.l.s4 %v2647_v1  ;;  %2387 = vmatprep.mubr.msk.bf16.mxu1 %vm270_vm0, %v2748_v4  ;;  %319 = vmatprep.mubr.bf16.mxu0 %v2648_v6  ;;  %s2649_s12 = smov 127   ;;  %s2650_s13 = smov 126   ;;  %v1590_v13 = vld [vmem:[%s3431_s2 + $0x18] sm:$0xff]  ;;  %v1589_v14 = vld [vmem:[%s3431_s2 + $0x10] sm:$0xff]  ;;  %v1587_v15 = vld [vmem:[%s3431_s2] sm:$0xff]  ;;  %vm277_vm1 = vcmask 1041408  }
  0x15   : > { %s219_s30 = scalar_select %p218_p10, %s2715_s22, 1  ;;  %v250_v3 = vshrl.u32 %v249_v0, 7  ;;  %2548 = vset.pattern.permute.xlu0 %v2648_v6  ;;  %2549 = vset.pattern.permute.xlu1 %v2648_v6  ;;  %v1588_v16 = vld [vmem:[%s3431_s2 + $0x8] sm:$0xff]  ;;  %vm267_vm2 = vcmask 1039360   ;;  %v2556_v20 = vld [vmem:[%s3430_s1 + $0x18] sm:$0xff]   ;;  %vm537_vm3 = vcmask 1031168  }
  0x16   : > { %v248_v5 = vunpack.c.0.s8 %v247_v2  ;;  %s2651_s14 = smov 110   ;;  %s2652_s15 = smov 109   ;;  %v2557_v30 = vld [vmem:[%s3430_s1] sm:$0xff]   ;;  %vm690_vm4 = vcmask 900096   ;;  %v2558_v36 = vld [vmem:[%s3430_s1 + $0x8] sm:$0xff]   ;;  %vm843_vm5 = vcmask 891904  }
  0x17   : > { %s2485_s8 = smul.u32 6, %s219_s30  ;;  %s2653_s16 = smov 108   ;;  %v2559_v37 = vld [vmem:[%s3430_s1 + $0x20] sm:$0xff]   ;;  %v2560_v44 = vld [vmem:[%s3430_s1 + $0x28] sm:$0xff]   ;;  %v2561_v50 = vld [vmem:[%s3430_s1 + $0x30] sm:$0xff]   ;;  %vm996_vm6 = vcmask 883712  }
  0x18   : > { %v251_v7 = vsub.s32 %v248_v5, %v250_v3  ;;  %s2654_s17 = smov 92   ;;  %s2655_s23 = smov 91   ;;  %v2562_v54 = vld [vmem:[%s3430_s1 + $0x38] sm:$0xff]   ;;  %v2563_v55 = vld [vmem:[%s3430_s1 + $0x40] sm:$0xff]   ;;  %v2564_v62 = vld [vmem:[%s3430_s1 + $0x48] sm:$0xff]   ;;  %vm1149_vm7 = vcmask 752640  }
  0x19   : > { %s222_s11 = scalar_lea.vmem %s3429_s0, %s2485_s8  ;;  %s2656_s25 = smov 90   ;;  %v2565_v5 = vld [vmem:[%s3430_s1 + $0x50] sm:$0xff]   ;;  %vm1302_vm8 = vcmask 744448   ;;  %vm1455_vm9 = vcmask 736256  }
  0x1a   : > { %v224_v8 = vld [vmem:[%s222_s11] sm:$0x3f]  ;;  %s2657_s9 = smov 1   ;;  %s2659_s11 = smov 2  }
  0x1b   : > { %v252_v9 = vrot.slane %v224_v8, %v251_v7  ;;  %v245_v10 = vcombine.high %v224_v8, %v224_v8  ;;  %s2661_s30 = smov [#allocation2]  }
  0x1c   : > { %s2589_s6 = sshll.u32 %s2661_s30, 4  ;;  %s2590_s6 = int_to_ptr.vmem [resolvable:$false] %s2589_s6 }
  0x1d   : > { %261 = vrot.lane.b32.xlu0 %v252_v9, %s2649_s12  ;;  %v2759_v11 = vrot.slane %v245_v10, %v251_v7  ;;  %v260_v12 = vcombine.high %v252_v9, %v252_v9  ;;  %v406_v24 = vsel %vm277_vm1, %v252_v9, 0  ;;  %v2566_v10 = vld [vmem:[%s3430_s1 + $0x58] sm:$0xff]   ;;  %s2591_s7 = scalar_lea.vmem %s2590_s6, 3072 }
  0x1f   : > { %265 = vrot.lane.b32.xlu1 %v2759_v11, %s2649_s12  ;;  %v412_v27 = vsel %vm277_vm1, %v2759_v11, 0 }
  0x21   : > { %263 = vrot.lane.b32.xlu0 %v260_v12, %s2649_s12 }
  0x23   : > { %531 = vrot.lane.b32.xlu1 %v252_v9, %s2650_s13 }
  0x25   : > { %533 = vrot.lane.b32.xlu0 %v260_v12, %s2650_s13 }
  0x27   : > { %535 = vrot.lane.b32.xlu1 %v2759_v11, %s2650_s13 }
  0x29   : > { %688 = vrot.lane.b32.xlu0 %v2759_v11, %s2651_s14 }
  0x2b   : > { %684 = vrot.lane.b32.xlu1 %v252_v9, %s2651_s14 }
  0x2d   : > { %686 = vrot.lane.b32.xlu0 %v260_v12, %s2651_s14 }
  0x2f   : > { %837 = vrot.lane.b32.xlu1 %v252_v9, %s2652_s15 }
  0x31   : > { %839 = vrot.lane.b32.xlu0 %v260_v12, %s2652_s15 }
  0x33   : > { %841 = vrot.lane.b32.xlu1 %v2759_v11, %s2652_s15  ;;  %s2492_s15 = smul.u32 1536, %s2715_s22 }
  0x35   : > { %994 = vrot.lane.b32.xlu0 %v2759_v11, %s2653_s16 }
  0x37   : > { %990 = vrot.lane.b32.xlu1 %v252_v9, %s2653_s16 }
  0x39   : > { %992 = vrot.lane.b32.xlu0 %v260_v12, %s2653_s16 }
  0x3b   : > { %1143 = vrot.lane.b32.xlu1 %v252_v9, %s2654_s17 }
  0x3d   : > { %1145 = vrot.lane.b32.xlu0 %v260_v12, %s2654_s17 }
  0x3f   : > { %1147 = vrot.lane.b32.xlu1 %v2759_v11, %s2654_s17 }
  0x41   : > { %1300 = vrot.lane.b32.xlu0 %v2759_v11, %s2655_s23 }
  0x43   : > { %1296 = vrot.lane.b32.xlu1 %v252_v9, %s2655_s23 }
  0x45   : > { %1298 = vrot.lane.b32.xlu0 %v260_v12, %s2655_s23  ;;  %s3382_s23 = scalar_lea.hbm %s3434_s5, %s2492_s15 }
  0x47   : > { %1449 = vrot.lane.b32.xlu1 %v252_v9, %s2656_s25 }
  0x49   : > { %1451 = vrot.lane.b32.xlu0 %v260_v12, %s2656_s25 }
  0x4b   : > { %1453 = vrot.lane.b32.xlu1 %v2759_v11, %s2656_s25 }
  0x4d   : > { %1608 = vperm.xlu0 %2548, %v1590_v13  }
  0x4f   : > { %1603 = vperm.xlu1 %2549, %v1589_v14  }
  0x51   : > { %1593 = vperm.xlu0 %2548, %v1587_v15  }
  0x53   : > { %1598 = vperm.xlu1 %2549, %v1588_v16  }
  0x8f   : > { %v262_v17 = vpop.permute.xlu0 %261 }
  0x91   : > { %v266_v18 = vpop.permute.xlu1 %265 }
  0x92   : > { %2475 = vmatprep.subr.msk.bf16.mxu1 %vm277_vm1, %v266_v18  ;;  %v285_v19 = vsel %vm277_vm1, %v266_v18, 0 }
  0x93   : > { %v264_v21 = vpop.permute.xlu0 %263  ;;  %2386 = vmatpush3.bf16.msra.mxu1 %v285_v19 }
  0x94   : > { %v269_v22 = vsel %vm267_vm2, %v264_v21, %v266_v18  ;;  %v268_v23 = vsel %vm267_vm2, %v262_v17, %v264_v21  ;;  %2249 = vmatprep.subr.msk.bf16.mxu1 %vm277_vm1, %v260_v12  ;;  %v2568_v17 = vld [vmem:[%s3430_s1 + $0x68] sm:$0xff]  }
  0x95   : > { %2242 = vmatprep.subr.msk.bf16.mxu0 %vm277_vm1, %v269_v22  ;;  %v279_v25 = vsel %vm277_vm1, %v268_v23, 0  ;;  %v532_v26 = vpop.permute.xlu1 %531  ;;  %v2569_v23 = vld [vmem:[%s3430_s1 + $0x70] sm:$0xff]  }
  0x96   : > { %302 = vmatpush1.bf16.msra.mxu0 %v279_v25  ;;  %2388 = vmatmul.mubr.msk.bf16.vlgmr.msra.gmra.mxu1 %vm270_vm0, %v2556_v20  ;;  %v2570_v25 = vld [vmem:[%s3430_s1 + $0x78] sm:$0xff]  }
  0x97   : > { %429 = vmatpush1.bf16.msra.mxu1 %v406_v24  ;;  %446 = vmatprep.mubr.bf16.mxu1 %v2648_v6  ;;  %v534_v28 = vpop.permute.xlu0 %533 }
  0x98   : > { %2476 = vmatprep.subr.msk.bf16.mxu0 %vm277_vm1, %v2759_v11  ;;  %v538_v39 = vsel %vm537_vm3, %v532_v26, %v534_v28  ;;  %v2567_v11 = vld [vmem:[%s3430_s1 + $0x60] sm:$0xff]  }
  0x99   : > { %2243 = vmatmul.mubr.msk.bf16.vlgmr.msra.gmra.mxu0 %vm270_vm0, %v2748_v4  ;;  %v536_v29 = vpop.permute.xlu1 %535  ;;  %v547_v41 = vsel %vm277_vm1, %v538_v39, 0  ;;  %v2571_v26 = vld [vmem:[%s3430_s1 + $0x80] sm:$0xff]  }
  0x9a   : > { %329 = vmatprep.mubr.bf16.mxu0 %v2648_v6  ;;  %2392 = vmatpush3.bf16.msra.mxu0 %v412_v27  ;;  %v539_v31 = vsel %vm537_vm3, %v534_v28, %v536_v29  ;;  %v553_v33 = vsel %vm277_vm1, %v536_v29, 0 }
  0x9b   : > { %2260 = vmatprep.subr.msk.bf16.mxu0 %vm277_vm1, %v539_v31  ;;  %2477 = vmatprep.subr.msk.bf16.mxu1 %vm277_vm1, %v536_v29  ;;  %v689_v32 = vpop.permute.xlu0 %688  ;;  %v2572_v29 = vld [vmem:[%s3430_s1 + $0x88] sm:$0xff]  }
  0x9c   : > { %v706_v48 = vsel %vm277_vm1, %v689_v32, 0 }
  0x9d   : > { %v685_v38 = vpop.permute.xlu1 %684 }
  0x9e   : > { %2250 = vmatmul.mubr.msk.bf16.vlgmr.msra.gmra.mxu1 %vm270_vm0, %v2557_v30 }
  0x9f   : > { %456 = vmatprep.mubr.bf16.mxu1 %v2648_v6  ;;  %2398 = vmatpush3.bf16.msra.mxu1 %v553_v33  ;;  %v687_v34 = vpop.permute.xlu0 %686 }
  0xa0   : > { %v692_v35 = vsel %vm690_vm4, %v687_v34, %v689_v32  ;;  %v691_v43 = vsel %vm690_vm4, %v685_v38, %v687_v34 }
  0xa1   : > { %2244 = vmatmul.mubr.msk.bf16.gmra.mxu0 %vm270_vm0, %v2556_v20  ;;  %2271 = vmatprep.subr.msk.bf16.mxu1 %vm277_vm1, %v692_v35  ;;  %v838_v42 = vpop.permute.xlu1 %837  ;;  %v700_v45 = vsel %vm277_vm1, %v691_v43, 0 }
  0xa2   : > { %2393 = vmatprep.mubr.msk.bf16.mxu0 %vm270_vm0, %v2557_v30 }
  0xa3   : > { %v840_v40 = vpop.permute.xlu0 %839 }
  0xa4   : > { %v844_v57 = vsel %vm843_vm5, %v838_v42, %v840_v40 }
  0xa5   : > { %v842_v47 = vpop.permute.xlu1 %841  ;;  %v853_v59 = vsel %vm277_vm1, %v844_v57, 0 }
  0xa6   : > { %2251 = vmatmul.mubr.msk.bf16.gmra.mxu1 %vm270_vm0, %v2558_v36  ;;  %v845_v49 = vsel %vm843_vm5, %v840_v40, %v842_v47  ;;  %v859_v52 = vsel %vm277_vm1, %v842_v47, 0 }
  0xa7   : > { %2399 = vmatprep.mubr.msk.bf16.mxu1 %vm270_vm0, %v2559_v37  ;;  %v995_v46 = vpop.permute.xlu0 %994 }
  0xa8   : > { %v1012_v3 = vsel %vm277_vm1, %v995_v46, 0 }
  0xa9   : > { %2394 = vmatmul.mubr.msk.bf16.vlgmr.msra.gmra.mxu0 %vm270_vm0, %v2558_v36  ;;  %v991_v56 = vpop.permute.xlu1 %990 }
  0xaa   : > { %570 = vmatpush1.bf16.msra.mxu0 %v547_v41  ;;  %587 = vmatprep.mubr.bf16.mxu0 %v2648_v6 }
  0xab   : > { %2478 = vmatprep.subr.msk.bf16.mxu0 %vm277_vm1, %v689_v32  ;;  %v993_v51 = vpop.permute.xlu0 %992 }
  0xac   : > { %v998_v53 = vsel %vm996_vm6, %v993_v51, %v995_v46  ;;  %v997_v61 = vsel %vm996_vm6, %v991_v56, %v993_v51 }
  0xad   : > { %v1144_v60 = vpop.permute.xlu1 %1143  ;;  %v1006_v63 = vsel %vm277_vm1, %v997_v61, 0 }
  0xae   : > { %2400 = vmatmul.mubr.msk.bf16.vlgmr.msra.gmra.mxu1 %vm270_vm0, %v2560_v44 }
  0xaf   : > { %723 = vmatpush1.bf16.msra.mxu1 %v700_v45  ;;  %740 = vmatprep.mubr.bf16.mxu1 %v2648_v6  ;;  %v1146_v58 = vpop.permute.xlu0 %1145 }
  0xb0   : > { %2479 = vmatprep.subr.msk.bf16.mxu1 %vm277_vm1, %v842_v47  ;;  %v1150_v13 = vsel %vm1149_vm7, %v1144_v60, %v1146_v58 }
  0xb1   : > { %2261 = vmatmul.mubr.msk.bf16.vlgmr.msra.gmra.mxu0 %vm270_vm0, %v2559_v37  ;;  %v1148_v2 = vpop.permute.xlu1 %1147  ;;  %v1159_v14 = vsel %vm277_vm1, %v1150_v13, 0 }
  0xb2   : > { %597 = vmatprep.mubr.bf16.mxu0 %v2648_v6  ;;  %2404 = vmatpush3.bf16.msra.mxu0 %v706_v48  ;;  %v1151_v4 = vsel %vm1149_vm7, %v1146_v58, %v1148_v2  ;;  %v1165_v8 = vsel %vm277_vm1, %v1148_v2, 0 }
  0xb3   : > { %2282 = vmatprep.subr.msk.bf16.mxu0 %vm277_vm1, %v845_v49  ;;  %v1301_v1 = vpop.permute.xlu0 %1300 }
  0xb4   : > { %v1318_v21 = vsel %vm277_vm1, %v1301_v1, 0 }
  0xb5   : > { %v1297_v12 = vpop.permute.xlu1 %1296 }
  0xb6   : > { %2272 = vmatmul.mubr.msk.bf16.vlgmr.msra.gmra.mxu1 %vm270_vm0, %v2561_v50 }
  0xb7   : > { %750 = vmatprep.mubr.bf16.mxu1 %v2648_v6  ;;  %2410 = vmatpush3.bf16.msra.mxu1 %v859_v52  ;;  %v1299_v7 = vpop.permute.xlu0 %1298 }
  0xb8   : > { %2293 = vmatprep.subr.msk.bf16.mxu1 %vm277_vm1, %v998_v53  ;;  %v1304_v9 = vsel %vm1302_vm8, %v1299_v7, %v1301_v1  ;;  %v1303_v16 = vsel %vm1302_vm8, %v1297_v12, %v1299_v7 }
  0xb9   : > { %2262 = vmatmul.mubr.msk.bf16.gmra.mxu0 %vm270_vm0, %v2560_v44  ;;  %v1450_v15 = vpop.permute.xlu1 %1449  ;;  %v1312_v18 = vsel %vm277_vm1, %v1303_v16, 0 }
  0xba   : > { %2405 = vmatprep.mubr.msk.bf16.mxu0 %vm270_vm0, %v2561_v50 }
  0xbb   : > { %v1452_v19 = vpop.permute.xlu0 %1451 }
  0xbc   : > { %v1456_v27 = vsel %vm1455_vm9, %v1450_v15, %v1452_v19 }
  0xbd   : > { %v1454_v20 = vpop.permute.xlu1 %1453  ;;  %v1465_v28 = vsel %vm277_vm1, %v1456_v27, 0 }
  0xbe   : > { %2273 = vmatmul.mubr.msk.bf16.gmra.mxu1 %vm270_vm0, %v2562_v54  ;;  %v1457_v22 = vsel %vm1455_vm9, %v1452_v19, %v1454_v20  ;;  %v1471_v24 = vsel %vm277_vm1, %v1454_v20, 0 }
  0xbf   : > { %2411 = vmatprep.mubr.msk.bf16.mxu1 %vm270_vm0, %v2563_v55 }
  0xc1   : > { %2406 = vmatmul.mubr.msk.bf16.vlgmr.msra.gmra.mxu0 %vm270_vm0, %v2562_v54 }
  0xc2   : > { %876 = vmatpush1.bf16.msra.mxu0 %v853_v59  ;;  %893 = vmatprep.mubr.bf16.mxu0 %v2648_v6 }
  0xc3   : > { %2480 = vmatprep.subr.msk.bf16.mxu0 %vm277_vm1, %v995_v46 }
  0xc6   : > { %2412 = vmatmul.mubr.msk.bf16.vlgmr.msra.gmra.mxu1 %vm270_vm0, %v2564_v62 }
  0xc7   : > { %1029 = vmatpush1.bf16.msra.mxu1 %v1006_v63  ;;  %1046 = vmatprep.mubr.bf16.mxu1 %v2648_v6 }
  0xc8   : > { %2481 = vmatprep.subr.msk.bf16.mxu1 %vm277_vm1, %v1148_v2 }
  0xc9   : > { %2283 = vmatmul.mubr.msk.bf16.vlgmr.msra.gmra.mxu0 %vm270_vm0, %v2563_v55 }
  0xca   : > { %903 = vmatprep.mubr.bf16.mxu0 %v2648_v6  ;;  %2416 = vmatpush3.bf16.msra.mxu0 %v1012_v3 }
  0xcb   : > { %2304 = vmatprep.subr.msk.bf16.mxu0 %vm277_vm1, %v1151_v4 }
  0xce   : > { %2294 = vmatmul.mubr.msk.bf16.vlgmr.msra.gmra.mxu1 %vm270_vm0, %v2565_v5 }
  0xcf   : > { %1056 = vmatprep.mubr.bf16.mxu1 %v2648_v6  ;;  %2422 = vmatpush3.bf16.msra.mxu1 %v1165_v8 }
  0xd0   : > { %2315 = vmatprep.subr.msk.bf16.mxu1 %vm277_vm1, %v1304_v9 }
  0xd1   : > { %2284 = vmatmul.mubr.msk.bf16.gmra.mxu0 %vm270_vm0, %v2564_v62 }
  0xd2   : > { %2417 = vmatprep.mubr.msk.bf16.mxu0 %vm270_vm0, %v2565_v5 }
  0xd6   : > { %2295 = vmatmul.mubr.msk.bf16.gmra.mxu1 %vm270_vm0, %v2566_v10 }
  0xd7   : > { %2423 = vmatprep.mubr.msk.bf16.mxu1 %vm270_vm0, %v2567_v11 }
  0xd9   : > { %2418 = vmatmul.mubr.msk.bf16.vlgmr.msra.gmra.mxu0 %vm270_vm0, %v2566_v10 }
  0xda   : > { %1182 = vmatpush1.bf16.msra.mxu0 %v1159_v14  ;;  %1199 = vmatprep.mubr.bf16.mxu0 %v2648_v6 }
  0xdb   : > { %2482 = vmatprep.subr.msk.bf16.mxu0 %vm277_vm1, %v1301_v1 }
  0xde   : > { %2424 = vmatmul.mubr.msk.bf16.vlgmr.msra.gmra.mxu1 %vm270_vm0, %v2568_v17 }
  0xdf   : > { %1335 = vmatpush1.bf16.msra.mxu1 %v1312_v18  ;;  %1352 = vmatprep.mubr.bf16.mxu1 %v2648_v6 }
  0xe0   : > { %2483 = vmatprep.subr.msk.bf16.mxu1 %vm277_vm1, %v1454_v20 }
  0xe1   : > { %2305 = vmatmul.mubr.msk.bf16.vlgmr.msra.gmra.mxu0 %vm270_vm0, %v2567_v11 }
  0xe2   : > { %1209 = vmatprep.mubr.bf16.mxu0 %v2648_v6  ;;  %2428 = vmatpush3.bf16.msra.mxu0 %v1318_v21 }
  0xe3   : > { %2326 = vmatprep.subr.msk.bf16.mxu0 %vm277_vm1, %v1457_v22 }
  0xe6   : > { %2316 = vmatmul.mubr.msk.bf16.vlgmr.msra.gmra.mxu1 %vm270_vm0, %v2569_v23 }
  0xe7   : > { %1362 = vmatprep.mubr.bf16.mxu1 %v2648_v6  ;;  %2434 = vmatpush3.bf16.msra.mxu1 %v1471_v24 }
  0xe9   : > { %2306 = vmatmul.mubr.msk.bf16.gmra.mxu0 %vm270_vm0, %v2568_v17 }
  0xea   : > { %2429 = vmatprep.mubr.msk.bf16.mxu0 %vm270_vm0, %v2569_v23 }
  0xee   : > { %2317 = vmatmul.mubr.msk.bf16.gmra.mxu1 %vm270_vm0, %v2570_v25 }
  0xef   : > { %2435 = vmatprep.mubr.msk.bf16.mxu1 %vm270_vm0, %v2571_v26 }
  0xf1   : > { %2430 = vmatmul.mubr.msk.bf16.vlgmr.msra.gmra.mxu0 %vm270_vm0, %v2570_v25 }
  0xf2   : > { %1488 = vmatpush1.bf16.msra.mxu0 %v1465_v28  ;;  %1505 = vmatprep.mubr.bf16.mxu0 %v2648_v6 }
  0xf6   : > { %2436 = vmatmul.mubr.msk.bf16.vlgmr.msra.gmra.mxu1 %vm270_vm0, %v2572_v29 }
  0xf9   : > { %2327 = vmatmul.mubr.msk.bf16.vlgmr.msra.gmra.mxu0 %vm270_vm0, %v2571_v26 }
  0xfa   : > { %1515 = vmatprep.mubr.bf16.mxu0 %v2648_v6 }
 0x101   : > { %2328 = vmatmul.mubr.msk.bf16.gmra.mxu0 %vm270_vm0, %v2572_v29 }
 0x156   : > { %v2389_v30 = vpop.f32.mrf.mxu1 }
 0x158   : > { %v374_v31 = vpop.f32.mrf.mxu1 }
 0x159   : > { %v321_v32 = vpop.f32.mrf.mxu0 }
 0x15a   : > { %v2390_v33 = vpop.f32.mrf.mxu1 }
 0x15b   : > { %v323_v34 = vpop.f32.mrf.mxu0 }
 0x15c   : > { %v377_v35 = vpop.f32.mrf.mxu1 }
 0x15d   : > { %v325_v36 = vpop.f32.mrf.mxu0 }
 0x15e   : > { %v448_v37 = vpop.f32.mrf.mxu1 }
 0x15f   : > { %v449_v38 = vadd.f32 %v448_v37, %v321_v32  ;;  %v327_v39 = vpop.f32.mrf.mxu0 }
 0x160   : > { %v450_v40 = vpop.f32.mrf.mxu1 }
 0x161   : > { %v451_v41 = vadd.f32 %v450_v40, %v323_v34  ;;  %v331_v42 = vpop.f32.mrf.mxu0 }
 0x162   : > { %v452_v43 = vpop.f32.mrf.mxu1 }
 0x163   : > { %v453_v44 = vadd.f32 %v452_v43, %v325_v36  ;;  %v2939_v45 = vpop.f32.mrf.mxu0 }
 0x164   : > { %v454_v6 = vpop.f32.mrf.mxu1 }
 0x165   : > { %v455_v46 = vadd.f32 %v454_v6, %v327_v39  ;;  %v335_v47 = vpop.f32.mrf.mxu0  ;;  %v1624_v39 = vand.u32 127, %v249_v0 }
 0x166   : > { %v458_v48 = vpop.f32.mrf.mxu1 }
 0x167   : > { %v2941_v49 = vadd.f32 %v458_v48, %v331_v42  ;;  %v2943_v50 = vpop.f32.mrf.mxu0 }
 0x168   : > { %v2945_v51 = vpop.f32.mrf.mxu1 }
 0x169   : > { %v2395_v52 = vpop.f32.mrf.mxu0 }
 0x16a   : > { %v2947_v53 = vadd.f32 %v2395_v52, %v2389_v30  ;;  %v462_v54 = vpop.f32.mrf.mxu1 }
 0x16b   : > { %v2949_v55 = vadd.f32 %v462_v54, %v335_v47  ;;  %v501_v56 = vpop.f32.mrf.mxu0  ;;  %v1625_v47 = vadd.s32 128, %v1624_v39 }
 0x16c   : > { %v502_v57 = vadd.f32 %v501_v56, %v374_v31  ;;  %v2951_v58 = vpop.f32.mrf.mxu1 }
 0x16d   : > { %v2396_v59 = vpop.f32.mrf.mxu0 }
 0x16e   : > { %v2953_v60 = vadd.f32 %v2396_v59, %v2390_v33  ;;  %v2955_v61 = vpop.f32.mrf.mxu1 }
 0x16f   : > { %v504_v62 = vpop.f32.mrf.mxu0 }
 0x170   : > { %v2957_v63 = vadd.f32 %v504_v62, %v377_v35  ;;  %v642_v1 = vpop.f32.mrf.mxu1 }
 0x171   : > { %v659_v2 = vadd.f32 %v642_v1, %v502_v57  ;;  %v589_v3 = vpop.f32.mrf.mxu0  ;;  %v3037_v57 = vmul.u32.u64.low 3817748708, %v1624_v39  ;;  %v3038_v59 = vmul.u32.u64.high 3817748708, %v1624_v39, %v3037_v57 }
 0x172   : > { %v657_v4 = vadd.f32 %v589_v3, %v449_v38  ;;  %v2959_v5 = vpop.f32.mrf.mxu1 }
 0x173   : > { %v591_v7 = vpop.f32.mrf.mxu0  ;;  %v1633_v57 = vshrl.u32 %v3038_v59, 4 }
 0x174   : > { %v2961_v8 = vadd.f32 %v591_v7, %v451_v41  ;;  %v2963_v9 = vpop.f32.mrf.mxu1 }
 0x175   : > { %v593_v10 = vpop.f32.mrf.mxu0 }
 0x176   : > { %v2965_v11 = vadd.f32 %v593_v10, %v453_v44  ;;  %v742_v12 = vpop.f32.mrf.mxu1  ;;  %v1626_v44 = vadd.s32 256, %v1624_v39 }
 0x177   : > { %v2967_v13 = vadd.f32 %v742_v12, %v657_v4  ;;  %v595_v14 = vpop.f32.mrf.mxu0 }
 0x178   : > { %v2969_v15 = vadd.f32 %v595_v14, %v455_v46  ;;  %v2971_v16 = vpop.f32.mrf.mxu1  ;;  %v3032_v54 = vmul.u32.u64.low 3817748708, %v1626_v44  ;;  %v3033_v0 = vmul.u32.u64.high 3817748708, %v1626_v44, %v3032_v54 }
 0x179   : > { %v2973_v17 = vpop.f32.mrf.mxu0 }
 0x17a   : > { %v2975_v18 = vpop.f32.mrf.mxu1 }
 0x17b   : > { %v2977_v19 = vpop.f32.mrf.mxu0 }
 0x17c   : > { %v2979_v20 = vpop.f32.mrf.mxu1 }
 0x17d   : > { %v2981_v21 = vpop.f32.mrf.mxu0 }
 0x17e   : > { %v2983_v22 = vpop.f32.mrf.mxu1 }
 0x17f   : > { %v2985_v23 = vpop.f32.mrf.mxu0 }
 0x180   : > { %v2987_v24 = vpop.f32.mrf.mxu1 }
 0x181   : > { %v2989_v25 = vpop.f32.mrf.mxu0 }
 0x182   : > { %v2991_v26 = vpop.f32.mrf.mxu1 }
 0x183   : > { %v795_v27 = vpop.f32.mrf.mxu0 }
 0x184   : > { %v2993_v28 = vadd.f32 %v795_v27, %v659_v2  ;;  %v2995_v29 = vpop.f32.mrf.mxu1  ;;  %v3042_v1 = vmul.u32.u64.low 3817748708, %v1625_v47  ;;  %v3043_v2 = vmul.u32.u64.high 3817748708, %v1625_v47, %v3042_v1  ;;  %v1655_v27 = vshrl.u32 %v3033_v0, 4 }
 0x185   : > { %v2997_v30 = vpop.f32.mrf.mxu0 }
 0x186   : > { %v2999_v31 = vpop.f32.mrf.mxu1  ;;  %v1644_v1 = vshrl.u32 %v3043_v2, 4 }
 0x187   : > { %v3001_v32 = vpop.f32.mrf.mxu0 }
 0x188   : > { %v3003_v33 = vpop.f32.mrf.mxu1 }
 0x189   : > { %v3005_v34 = vpop.f32.mrf.mxu0 }
 0x18a   : > { %v3007_v35 = vpop.f32.mrf.mxu1 }
 0x18b   : > { %v3009_v36 = vpop.f32.mrf.mxu0 }
 0x18c   : > { %v3011_v37 = vpop.f32.mrf.mxu1 }
 0x18d   : > { %v3013_v38 = vpop.f32.mrf.mxu0 }
 0x18e   : > { %v3016_v40 = vpop.f32.mrf.mxu1 }
 0x18f   : > { %v3018_v41 = vpop.f32.mrf.mxu0 }
 0x190   : > { %v3020_v42 = vpop.f32.mrf.mxu1 }
 0x191   : > { %v3022_v43 = vpop.f32.mrf.mxu0 }
 0x192   : > { %v3024_v6 = vpop.f32.mrf.mxu1 }
 0x193   : > { %3437 = vst [vmem:[#allocation5_spill] sm:$0xff] %v3024_v6  ;;  %v3026_v46 = vpop.f32.mrf.mxu0 }
 0x194   : > { %3438 = vst [vmem:[#allocation6_spill] sm:$0xff] %v3026_v46  ;;  %v3028_v48 = vpop.f32.mrf.mxu1 }
 0x195   : > { %3439 = vst [vmem:[#allocation7_spill] sm:$0xff] %v3028_v48  ;;  %v3030_v52 = vpop.f32.mrf.mxu0  ;;  %v1645_v48 = vmul.u32 18, %v1644_v1 }
 0x196   : > { %3440 = vst [vmem:[#allocation8_spill] sm:$0xff] %v3030_v52  ;;  %v3035_v56 = vpop.f32.mrf.mxu1 }
 0x197   : > { %3441 = vst [vmem:[#allocation9_spill] sm:$0xff] %v3035_v56  ;;  %v3040_v62 = vpop.f32.mrf.mxu0 }
 0x198   : > { %3442 = vst [vmem:[#allocation10_spill] sm:$0xff] %v3040_v62  ;;  %v3045_v3 = vpop.f32.mrf.mxu1 }
 0x199   : > { %3443 = vst [vmem:[#allocation11_spill] sm:$0xff] %v3045_v3  ;;  %v3047_v4 = vpop.f32.mrf.mxu0 }
 0x19a   : > { %v3049_v7 = vpop.f32.mrf.mxu1 }
 0x19b   : > { %3444 = vst [vmem:[#allocation12_spill] sm:$0xff] %v3049_v7  ;;  %v3051_v10 = vpop.f32.mrf.mxu0  ;;  %v1656_v7 = vmul.u32 18, %v1655_v27 }
 0x19c   : > { %3445 = vst [vmem:[#allocation13_spill] sm:$0xff] %v3051_v10  ;;  %v3053_v12 = vpop.f32.mrf.mxu1 }
 0x19d   : > { %3446 = vst [vmem:[#allocation14_spill] sm:$0xff] %v3053_v12  ;;  %v3055_v14 = vpop.f32.mrf.mxu0  ;;  %v1634_v12 = vmul.u32 18, %v1633_v57  ;;  %v1657_v59 = vsub.s32 %v1626_v44, %v1656_v7 }
 0x19e   : > { %3447 = vst [vmem:[#allocation15_spill] sm:$0xff] %v3055_v14  ;;  %v3058_v54 = vpop.f32.mrf.mxu1 }
 0x19f   : > { %v3061_v62 = vpop.f32.mrf.mxu0  ;;  %vm1662_vm10 = vcmp.ne.s32.totalorder %v1657_v59, 0  ;;  %vm1665_vm11 = vcmp.lt.s32.totalorder %v1657_v59, 0 }
 0x1a0   : > { %3448 = vst [vmem:[#allocation16_spill] sm:$0xff] %v3061_v62  ;;  %v3064_v3 = vpop.f32.mrf.mxu1  ;;  %v1635_v62 = vsub.s32 %v1624_v39, %v1634_v12  ;;  %vm1668_vm0 = vmand %vm1665_vm11, %vm1662_vm10  ;;  %v1671_v39 = vadd.s32 18, %v1657_v59  ;;  %vm1703_vm11 = vcmask 261120  }
 0x1a1   : > { %3449 = vst [vmem:[#allocation17_spill] sm:$0xff] %v3064_v3  ;;  %v3066_v56 = vpop.f32.mrf.mxu0  ;;  %v1646_v3 = vsub.s32 %v1625_v47, %v1645_v48 }
 0x1a2   : > { %v3068_v10 = vpop.f32.mrf.mxu1  ;;  %vm1660_vm12 = vcmp.ne.s32.totalorder %v1635_v62, 0  ;;  %vm1663_vm13 = vcmp.lt.s32.totalorder %v1635_v62, 0  ;;  %v1669_v47 = vadd.s32 18, %v1635_v62 }
 0x1a3   : > { %v3070_v52 = vpop.f32.mrf.mxu0  ;;  %vm1661_vm14 = vcmp.ne.s32.totalorder %v1646_v3, 0  ;;  %vm1664_vm15 = vcmp.lt.s32.totalorder %v1646_v3, 0  ;;  %vm1666_vm1 = vmand %vm1663_vm13, %vm1660_vm12  ;;  %v1670_v48 = vadd.s32 18, %v1646_v3  ;;  %vm1755_vm13 = vcmask 7168  }
 0x1a4   : > { %v3072_v0 = vpop.f32.mrf.mxu1  ;;  %vm1667_vm2 = vmand %vm1664_vm15, %vm1661_vm14 }
 0x1a5   : > { %3450 = vst [vmem:[#allocation18_spill] sm:$0xff] %v3072_v0  ;;  %v3074_v14 = vpop.f32.mrf.mxu0  ;;  %v3109_v0 = vsel %vm1667_vm2, %v1670_v48, %v1646_v3  ;;  %v3462_v3 = vld [vmem:[#allocation15_spill] sm:$0xff]  ;;  %v3468_v48 = vld [vmem:[#allocation13_spill] sm:$0xff] }
 0x1a6   : > { %3451 = vst [vmem:[#allocation19_spill] sm:$0xff] %v3074_v14  ;;  %v3076_v46 = vpop.f32.mrf.mxu1  ;;  %vm1676_vm7 = vcmp.ge.s32.totalorder %v3109_v0, 1  ;;  %vm1679_vm8 = vcmp.le.s32.totalorder %v3109_v0, 16 }
 0x1a7   : > { %3452 = vst [vmem:[#allocation20_spill] sm:$0xff] %v3076_v46  ;;  %v3078_v2 = vpop.f32.mrf.mxu0  ;;  %vm3240_vm12 = vmand %vm1676_vm7, %vm1679_vm8 }
 0x1a8   : > { %v3080_v6 = vpop.f32.mrf.mxu1 }
 0x1a9   : > { %3453 = vst [vmem:[#allocation21_spill] sm:$0xff] %v3080_v6  ;;  %v3082_v27 = vpop.f32.mrf.mxu0 }
 0x1aa   : > { %3454 = vst [vmem:[#allocation22_spill] sm:$0xff] %v3082_v27  ;;  %v3084_v57 = vpop.f32.mrf.mxu1 }
 0x1ab   : > { %3455 = vst [vmem:[#allocation23_spill] sm:$0xff] %v3084_v57  ;;  %v3086_v1 = vpop.f32.mrf.mxu0  ;;  %v665_v57 = vadd.f32 %v2955_v61, %v2947_v53  ;;  %v668_v53 = vadd.f32 %v2959_v5, %v2953_v60 }
 0x1ac   : > { %3456 = vst [vmem:[#allocation24_spill] sm:$0xff] %v3086_v1  ;;  %v3088_v44 = vpop.f32.mrf.mxu1  ;;  %v461_v1 = vadd.f32 %v2945_v51, %v2939_v45  ;;  %v662_v45 = vadd.f32 %v2963_v9, %v2957_v63  ;;  %v663_v51 = vadd.f32 %v2973_v17, %v2941_v49  ;;  %v814_v49 = vadd.f32 %v2979_v20, %v2969_v15 }
 0x1ad   : > { %3457 = vst [vmem:[#allocation25_spill] sm:$0xff] %v3088_v44  ;;  %v3090_v7 = vpop.f32.mrf.mxu0  ;;  %v3102_v44 = vsel %vm1668_vm0, %v1671_v39, %v1657_v59  ;;  %v818_v46 = vadd.f32 %v2989_v25, %v665_v57  ;;  %v666_v25 = vadd.f32 %v2981_v21, %v2949_v55  ;;  %v965_v20 = vadd.f32 %v3003_v33, %v2993_v28  ;;  %v3463_v57 = vld [vmem:[#allocation7_spill] sm:$0xff] }
 0x1ae   : > { %3458 = vst [vmem:[#allocation26_spill] sm:$0xff] %v3090_v7  ;;  %v3092_v12 = vpop.f32.mrf.mxu1  ;;  %v465_v7 = vadd.f32 %v2951_v58, %v2943_v50  ;;  %v664_v61 = vadd.f32 %v2977_v19, %v461_v1  ;;  %v811_v50 = vadd.f32 %v2971_v16, %v2961_v8  ;;  %v813_v58 = vadd.f32 %v2975_v18, %v2965_v11  ;;  %v3464_v1 = vld [vmem:[#allocation8_spill] sm:$0xff] }
 0x1af   : > { %3459 = vst [vmem:[#allocation27_spill] sm:$0xff] %v3092_v12  ;;  %v3096_v6 = vpop.f32.mrf.mxu0  ;;  %v3107_v12 = vsel %vm1666_vm1, %v1669_v47, %v1635_v62  ;;  %v971_v60 = vadd.f32 %v2999_v31, %v818_v46  ;;  %v816_v63 = vadd.f32 %v2983_v22, %v663_v51  ;;  %v819_v11 = vadd.f32 %v2991_v26, %v666_v25  ;;  %v3461_v62 = vld [vmem:[#allocation6_spill] sm:$0xff] }
 0x1b0   : > { %v3100_v27 = vpop.f32.mrf.mxu1  ;;  %v667_v9 = vadd.f32 %v2985_v23, %v465_v7  ;;  %v817_v17 = vadd.f32 %v2987_v24, %v664_v61  ;;  %v821_v16 = vadd.f32 %v2997_v30, %v668_v53  ;;  %v815_v55 = vadd.f32 %v3001_v32, %v662_v45  ;;  %v3470_v25 = vld [vmem:[#allocation14_spill] sm:$0xff] }
 0x1b1   : > { %v2431_v14 = vpop.f32.mrf.mxu0  ;;  %v1124_v18 = vadd.f32 %v3047_v4, %v971_v60  ;;  %vm1677_vm3 = vcmp.ge.s32.totalorder %v3102_v44, 1  ;;  %vm1680_vm4 = vcmp.le.s32.totalorder %v3102_v44, 16  ;;  %v963_v21 = vadd.f32 %v3005_v34, %v2967_v13  ;;  %v3460_v34 = vld [vmem:[#allocation5_spill] sm:$0xff] }
 0x1b2   : > { %v3118_v59 = vpop.f32.mrf.mxu1  ;;  %v820_v15 = vadd.f32 %v2995_v29, %v667_v9  ;;  %v964_v22 = vadd.f32 %v3009_v36, %v811_v50  ;;  %v974_v24 = vadd.f32 %v3007_v35, %v821_v16  ;;  %v968_v26 = vadd.f32 %v3011_v37, %v815_v55  ;;  %v3469_v50 = vld [vmem:[#allocation12_spill] sm:$0xff]  ;;  %v3472_v16 = vld [vmem:[#allocation17_spill] sm:$0xff]  ;;  %vm3195_vm9 = vmand %vm1677_vm3, %vm1680_vm4 }
 0x1b3   : > { %v3127_v5 = vpop.f32.mrf.mxu0  ;;  %v966_v30 = vadd.f32 %v3013_v38, %v813_v58  ;;  %v1277_v31 = vadd.f32 %v3058_v54, %v1124_v18  ;;  %v1116_v29 = vadd.f32 %v3016_v40, %v963_v21  ;;  %v967_v46 = vadd.f32 %v3018_v41, %v814_v49  ;;  %v3465_v40 = vld [vmem:[#allocation9_spill] sm:$0xff]  ;;  %v3466_v41 = vld [vmem:[#allocation10_spill] sm:$0xff]  ;;  %v3471_v49 = vld [vmem:[#allocation16_spill] sm:$0xff] }
 0x1b4   : > { %v3134_v8 = vpop.f32.mrf.mxu1  ;;  %v1117_v28 = vadd.f32 %v3020_v42, %v964_v22  ;;  %v969_v13 = vadd.f32 %v3022_v43, %v816_v63  ;;  %v970_v35 = vadd.f32 %v3461_v62, %v817_v17  ;;  %v1127_v37 = vadd.f32 %v3462_v3, %v974_v24  ;;  %v3467_v42 = vld [vmem:[#allocation11_spill] sm:$0xff]  ;;  %v1604_v17 = vpop.permute.xlu1 %1603  ;;  %v3473_v21 = vld [vmem:[#allocation18_spill] sm:$0xff]  ;;  %v3480_v3 = vld [vmem:[#allocation24_spill] sm:$0xff] }
 0x1b5   : > { %v2432_v19 = vpop.f32.mrf.mxu0  ;;  %v1119_v36 = vadd.f32 %v3460_v34, %v966_v30  ;;  %v1430_v4 = vadd.f32 %v2431_v14, %v1277_v31  ;;  %v1120_v54 = vadd.f32 %v3463_v57, %v967_v46  ;;  %v972_v39 = vadd.f32 %v3464_v1, %v819_v11  ;;  %v3168_v14 = vpop.permute.xlu0 %1608  ;;  %v3476_v30 = vld [vmem:[#allocation22_spill] sm:$0xff] }
 0x1b6   : > { %v2437_v23 = vpop.f32.mrf.mxu1  ;;  %v1122_v7 = vadd.f32 %v3465_v40, %v969_v13  ;;  %v973_v47 = vadd.f32 %v3466_v41, %v820_v15  ;;  %vm1675_vm5 = vcmp.ge.s32.totalorder %v3107_v12, 1  ;;  %vm1678_vm6 = vcmp.le.s32.totalorder %v3107_v12, 16 }
 0x1b7   : > { %v1410_v32 = vpop.f32.mrf.mxu0  ;;  %v1123_v43 = vadd.f32 %v3467_v42, %v970_v35  ;;  %v1118_v53 = vadd.f32 %v3468_v48, %v965_v20  ;;  %v1280_v45 = vadd.f32 %v3068_v10, %v1127_v37  ;;  %v1583_v51 = vadd.f32 %v2437_v23, %v1430_v4  ;;  %v3474_v23 = vld [vmem:[#allocation19_spill] sm:$0xff]  ;;  %vm3216_vm10 = vmand %vm1675_vm5, %vm1678_vm6 }
 0x1b8   : > { %v1560_v33 = vpop.f32.mrf.mxu1  ;;  %v1125_v58 = vadd.f32 %v3469_v50, %v972_v39  ;;  %v1126_v60 = vadd.f32 %v3470_v25, %v973_v47  ;;  %v1121_v63 = vadd.f32 %v3471_v49, %v968_v26  ;;  %v1269_v9 = vadd.f32 %v3066_v56, %v1116_v29  ;;  %v3475_v26 = vld [vmem:[#allocation20_spill] sm:$0xff]  ;;  %v3477_v29 = vld [vmem:[#allocation25_spill] sm:$0xff]  ;;  %v3481_v4 = vld [vmem:[#allocation27_spill] sm:$0xff]  ;;  %v1599_v25 = vpop.permute.xlu1 %1598 }
 0x1b9   : > { %v1507_v38 = vpop.f32.mrf.mxu0  ;;  %v1271_v10 = vadd.f32 %v3472_v16, %v1118_v53  ;;  %v1270_v55 = vadd.f32 %v3070_v52, %v1117_v28  ;;  %v1273_v18 = vadd.f32 %v3078_v2, %v1120_v54  ;;  %v1433_v15 = vadd.f32 %v2432_v19, %v1280_v45  ;;  %v3478_v28 = vld [vmem:[#allocation21_spill] sm:$0xff]  ;;  %v3479_v19 = vld [vmem:[#allocation23_spill] sm:$0xff]  ;;  %v3484_v54 = vld [vmem:[#allocation26_spill] sm:$0xff]  ;;  %v1594_v48 = vpop.permute.xlu0 %1593 }
 0x1ba   : > { %v2438_v11 = vpop.f32.mrf.mxu1  ;;  %v1274_v22 = vadd.f32 %v3473_v21, %v1121_v63  ;;  %v1272_v24 = vadd.f32 %v3474_v23, %v1119_v36  ;;  %v1422_v56 = vadd.f32 %v3475_v26, %v1269_v9  ;;  %v1275_v31 = vadd.f32 %v3476_v30, %v1122_v7 }
 0x1bb   : > { %v1509_v61 = vpop.f32.mrf.mxu0  ;;  %v1426_v46 = vadd.f32 %v3477_v29, %v1273_v18  ;;  %v1424_v13 = vadd.f32 %v3127_v5, %v1271_v10  ;;  %v3185_v34 = vadd.f32 %v1604_v17, %v1583_v51  ;;  %v1586_v62 = vadd.f32 %v2438_v11, %v1433_v15 }
 0x1bc   : > { %v1423_v2 = vadd.f32 %v3478_v28, %v1270_v55  ;;  %v1425_v35 = vadd.f32 %v3479_v19, %v1272_v24  ;;  %v1276_v37 = vadd.f32 %v3480_v3, %v1123_v43  ;;  %v1428_v36 = vadd.f32 %v3481_v4, %v1275_v31  ;;  %v1563_v5 = vpop.f32.mrf.mxu1 }
 0x1bd   : > { %v1511_v20 = vpop.f32.mrf.mxu0  ;;  %v1278_v1 = vadd.f32 %v3484_v54, %v1125_v58  ;;  %v1427_v39 = vadd.f32 %v1410_v32, %v1274_v22  ;;  %v1577_v40 = vadd.f32 %v1560_v33, %v1424_v13  ;;  %v1279_v47 = vadd.f32 %v3096_v6, %v1126_v60 }
 0x1be   : > { %v1429_v42 = vadd.f32 %v3100_v27, %v1276_v37  ;;  %v1575_v43 = vadd.f32 %v1507_v38, %v1422_v56  ;;  %v3203_v44 = vadd.f32 %v3168_v14, %v1586_v62  ;;  %v1576_v45 = vadd.f32 %v1509_v61, %v1423_v2 }
 0x1bf   : > { %v1513_v52 = vpop.f32.mrf.mxu0  ;;  %v1580_v51 = vadd.f32 %v1563_v5, %v1427_v39  ;;  %v1698_v32 = vsel %vm3195_vm9, %v3185_v34, 0.0  ;;  %v1431_v33 = vadd.f32 %v3118_v59, %v1278_v1  ;;  %v1578_v58 = vadd.f32 %v1511_v20, %v1425_v35 }
 0x1c0   : > { %v1579_v7 = vadd.f32 %v1513_v52, %v1426_v46  ;;  %v1432_v38 = vadd.f32 %v3134_v8, %v1279_v47  ;;  %v3220_v60 = vadd.f32 %v1594_v48, %v1577_v40  ;;  %v1731_v11 = vmul.f32 %v1698_v32, %v1698_v32 }
 0x1c1   : > { %v1517_v41 = vpop.f32.mrf.mxu0  ;;  %v3229_v16 = vadd.f32 %v1594_v48, %v1575_v43  ;;  %v1701_v12 = vsel %vm3195_vm9, %v3203_v44, 0.0  ;;  %v3234_v10 = vadd.f32 %v1594_v48, %v1576_v45  ;;  %v3244_v55 = vadd.f32 %v1599_v25, %v1580_v51 }
 0x1c2   : > { %v1581_v53 = vadd.f32 %v1517_v41, %v1428_v36  ;;  %v3222_v49 = vadd.f32 %v1599_v25, %v1579_v7  ;;  %v3246_v15 = vadd.f32 %v1599_v25, %v1578_v58  ;;  %v1714_v31 = vsel %vm1703_vm11, %v1698_v32, 0.0 }
 0x1c3   : > { %v1519_v50 = vpop.f32.mrf.mxu0  ;;  %v1746_v29 = vsel %vm1703_vm11, %v1731_v11, 0.0  ;;  %v1691_v46 = vsel %vm3240_vm12, %v3234_v10, 0.0  ;;  %v1734_v52 = vmul.f32 %v1701_v12, %v1701_v12  ;;  %v1695_v2 = vsel %vm3195_vm9, %v3244_v55, 0.0 }
 0x1c4   : > { %v3209_v6 = vadd.f32 %v1604_v17, %v1581_v53  ;;  %v1582_v27 = vadd.f32 %v1519_v50, %v1429_v42  ;;  %v1694_v0 = vsel %vm3240_vm12, %v3222_v49, 0.0  ;;  %v1693_v28 = vsel %vm3216_vm10, %v3246_v15, 0.0 }
 0x1c5   : > { %v1521_v59 = vpop.f32.mrf.mxu0  ;;  %v1727_v19 = vmul.f32 %v1694_v0, %v1694_v0  ;;  %v1690_v36 = vsel %vm3216_vm10, %v3229_v16, 0.0  ;;  %v1726_v54 = vmul.f32 %v1693_v28, %v1693_v28  ;;  %v1692_v1 = vsel %vm3195_vm9, %v3220_v60, 0.0 }
 0x1c6   : > { %v3224_v63 = vadd.f32 %v1604_v17, %v1582_v27  ;;  %v1584_v9 = vadd.f32 %v1521_v59, %v1431_v33  ;;  %v1696_v8 = vsel %vm3216_vm10, %v3209_v6, 0.0  ;;  %v1751_v39 = vsel %vm1703_vm11, %v1734_v52, 0.0  ;;  %v1760_v59 = vld [vmem:[%s3433_s4] sm:$0xff] }
 0x1c7   : > { %v1523_v18 = vpop.f32.mrf.mxu0  ;;  %v1729_v24 = vmul.f32 %v1696_v8, %v1696_v8  ;;  %v1719_v40 = vsel %vm1703_vm11, %v1701_v12, 0.0  ;;  %v1728_v7 = vmul.f32 %v1695_v2, %v1695_v2  ;;  %v1724_v41 = vmul.f32 %v1691_v46, %v1691_v46  ;;  %2447 = vmatprep.mubr.msk.f32.mxu1 %vm1703_vm11, %v1760_v59 }
 0x1c8   : > { %v3249_v20 = vadd.f32 %v3168_v14, %v1584_v9  ;;  %v1585_v21 = vadd.f32 %v1523_v18, %v1432_v38  ;;  %v1697_v22 = vsel %vm3240_vm12, %v3224_v63, 0.0  ;;  %v1740_v43 = vadd.f32 %v1727_v19, %v1726_v54 }
 0x1c9   : > { %v1713_v23 = vadd.f32 %v1697_v22, %v1696_v8  ;;  %v1730_v26 = vmul.f32 %v1697_v22, %v1697_v22  ;;  %v1708_v48 = vadd.f32 %v1694_v0, %v1693_v28  ;;  %v1723_v53 = vmul.f32 %v1690_v36, %v1690_v36 }
 0x1ca   : > { %v1699_v56 = vsel %vm3216_vm10, %v3249_v20, 0.0  ;;  %v3261_v30 = vadd.f32 %v3168_v14, %v1585_v21  ;;  %v1741_v45 = vsel %vm1703_vm11, %v1728_v7, 0.0  ;;  %v1709_v51 = vsel %vm1703_vm11, %v1695_v2, 0.0 }
 0x1cb   : > { %v1715_v13 = vadd.f32 %v1714_v31, %v1713_v23  ;;  %v1745_v62 = vadd.f32 %v1730_v26, %v1729_v24  ;;  %v1732_v3 = vmul.f32 %v1699_v56, %v1699_v56  ;;  %v1725_v50 = vmul.f32 %v1692_v1, %v1692_v1  ;;  %v1762_v31 = vld [vmem:[%s3433_s4 + $0x10] sm:$0xff] }
 0x1cc   : > { %v1700_v14 = vsel %vm3240_vm12, %v3261_v30, 0.0  ;;  %v1742_v57 = vadd.f32 %v1741_v45, %v1740_v43  ;;  %v1710_v32 = vadd.f32 %v1709_v51, %v1708_v48  ;;  %v1735_v33 = vadd.f32 %v1724_v41, %v1723_v53 }
 0x1cd   : > { %1716 = vadd.xlane.f32.xlu0 %v1715_v13  ;;  %v1747_v35 = vadd.f32 %v1746_v29, %v1745_v62  ;;  %v1733_v37 = vmul.f32 %v1700_v14, %v1700_v14  ;;  %v1718_v4 = vadd.f32 %v1700_v14, %v1699_v56  ;;  %v1702_v58 = vadd.f32 %v1691_v46, %v1690_v36  ;;  %v1761_v56 = vld [vmem:[%s3433_s4 + $0x8] sm:$0xff]  ;;  %v1763_v29 = vld [vmem:[%s3433_s4 + $0x18] sm:$0xff]  ;;  %v1902_v36 = vld [vmem:[%s3432_s3] sm:$0xff] }
 0x1ce   : > { %v1736_v25 = vsel %vm1703_vm11, %v1725_v50, 0.0  ;;  %v1704_v27 = vsel %vm1703_vm11, %v1692_v1, 0.0  ;;  %2461 = vmatprep.mubr.msk.f32.mxu0 %vm1703_vm11, %v1902_v36  ;;  %v2658_v59 = vmov 1  }
 0x1cf   : > { %1748 = vadd.xlane.f32.xlu1 %v1747_v35  ;;  %v1750_v5 = vadd.f32 %v1733_v37, %v1732_v3  ;;  %v1720_v42 = vadd.f32 %v1719_v40, %v1718_v4  ;;  %v1737_v38 = vadd.f32 %v1736_v25, %v1735_v33  ;;  %v1705_v61 = vadd.f32 %v1704_v27, %v1702_v58 }
 0x1d0   : > { %2551 = vset.pattern.permute.xlu0 %v2658_v59  ;;  %2550 = vset.pattern.permute.xlu1 %v2658_v59 }
 0x1d1   : > { %v1752_v47 = vadd.f32 %v1751_v39, %v1750_v5  ;;  %v1904_v5 = vld [vmem:[%s3432_s3 + $0x10] sm:$0xff] }
 0x1d3   : > { %1753 = vadd.xlane.f32.xlu0 %v1752_v47  ;;  %1721 = vadd.xlane.f32.xlu1 %v1720_v42 }
 0x1d7   : > { %1743 = vadd.xlane.f32.xlu1 %v1742_v57  ;;  %1711 = vadd.xlane.f32.xlu0 %v1710_v32 }
 0x1db   : > { %1738 = vadd.xlane.f32.xlu1 %v1737_v38  ;;  %1706 = vadd.xlane.f32.xlu0 %v1705_v61  ;;  %v1903_v38 = vld [vmem:[%s3432_s3 + $0x8] sm:$0xff]  ;;  %v1905_v61 = vld [vmem:[%s3432_s3 + $0x18] sm:$0xff] }
 0x256   : > { %v1717_v9 = vpop.xlane.xlu0 %1716 }
 0x258   : > { %v1749_v8 = vpop.xlane.xlu1 %1748 }
 0x259   : > { %v1758_v18 = vsel %vm1755_vm13, %v1717_v9, %v1749_v8 }
 0x25c   : > { %v1754_v11 = vpop.xlane.xlu0 %1753  ;;  %v1722_v12 = vpop.xlane.xlu1 %1721 }
 0x25d   : > { %v1759_v17 = vsel %vm1755_vm13, %v1722_v12, %v1754_v11  ;;  %v2581_v11 = vld [vmem:[%s3431_s2 + $0x8] sm:$0xff] }
 0x25e   : > { %2439 = vmatprep.subr.mxu1 %v1759_v17 }
 0x25f   : > { %2440 = vmatpush3.msra.mxu1 %v1759_v17 }
 0x260   : > { %2441 = vmatprep.subr.mxu1 %v1758_v18  ;;  %v1744_v21 = vpop.xlane.xlu1 %1743  ;;  %v1712_v22 = vpop.xlane.xlu0 %1711 }
 0x261   : > { %2442 = vmatpush3.msra.mxu1 %v1758_v18  ;;  %v1757_v0 = vsel %vm1755_vm13, %v1712_v22, %v1744_v21  ;;  %v2582_v18 = vld [vmem:[%s3431_s2] sm:$0xff]  ;;  %v2583_v22 = vld [vmem:[%s3431_s2 + $0x18] sm:$0xff] }
 0x262   : > { %2443 = vmatprep.subr.mxu1 %v1757_v0 }
 0x263   : > { %2444 = vmatpush3.msra.mxu1 %v1757_v0 }
 0x264   : > { %v1739_v23 = vpop.xlane.xlu1 %1738  ;;  %v1707_v24 = vpop.xlane.xlu0 %1706 }
 0x265   : > { %v1756_v26 = vsel %vm1755_vm13, %v1707_v24, %v1739_v23  ;;  %v2584_v24 = vld [vmem:[%s3431_s2 + $0x10] sm:$0xff] }
 0x266   : > { %2445 = vmatprep.subr.mxu1 %v1756_v26 }
 0x267   : > { %2446 = vmatpush3.msra.mxu1 %v1756_v26 }
 0x268   : > { %2448 = vmatmul.mubr.msk.f32.vlgmr.msra.gmra.mxu1 %vm1703_vm11, %v1761_v56 }
 0x269   : > { %2450 = vmatprep.mubr.msk.f32.mxu1 %vm1703_vm11, %v1762_v31 }
 0x26c   : > { %2451 = vmatmul.mubr.msk.f32.gmra.mxu1 %vm1703_vm11, %v1763_v29 }
 0x26d   : > { %2464 = vmatprep.mubr.msk.f32.mxu1 %vm1703_vm11, %v1904_v5 }
 0x328   : > { %v2449_v46 = vpop.f32.mrf.mxu1 }
 0x329   : > { %v1863_v35 = vmul.f32 0.00390625, %v2449_v46 }
 0x32a   : > { %v1842_v13 = vpop.f32.mrf.mxu1 }
 0x32b   : > { %v1862_v14 = vmul.f32 0.00390625, %v1842_v13  ;;  %v1867_v4 = vmul.f32 %v1863_v35, %v1863_v35 }
 0x32c   : > { %v2452_v62 = vpop.f32.mrf.mxu1 }
 0x32d   : > { %v1865_v52 = vmul.f32 0.00390625, %v2452_v62  ;;  %v1866_v37 = vmul.f32 %v1862_v14, %v1862_v14 }
 0x32e   : > { %v1852_v28 = vpop.f32.mrf.mxu1 }
 0x32f   : > { %v1864_v2 = vmul.f32 0.00390625, %v1852_v28  ;;  %v1869_v19 = vmul.f32 %v1865_v52, %v1865_v52 }
 0x331   : > { %1880 = vrot.lane.b32.xlu0 %v1869_v19, %s2657_s9  ;;  %v1868_v3 = vmul.f32 %v1864_v2, %v1864_v2 }
 0x333   : > { %1878 = vrot.lane.b32.xlu1 %v1868_v3, %s2657_s9 }
 0x335   : > { %1874 = vrot.lane.b32.xlu0 %v1866_v37, %s2657_s9 }
 0x337   : > { %1876 = vrot.lane.b32.xlu1 %v1867_v4, %s2657_s9 }
 0x3a3   : > { %v1881_v54 = vpop.permute.xlu0 %1880 }
 0x3a4   : > { %v1889_v1 = vsub.f32 %v1865_v52, %v1881_v54 }
 0x3a5   : > { %v1879_v39 = vpop.permute.xlu1 %1878 }
 0x3a6   : > { %v1893_v40 = vadd.f32 1e-05, %v1889_v1  ;;  %v1888_v7 = vsub.f32 %v1864_v2, %v1879_v39 }
 0x3a7   : > { %v1875_v41 = vpop.permute.xlu0 %1874 }
 0x3a8   : > { %2573 = vrsqrt.f32 %v1893_v40  ;;  %v1892_v47 = vadd.f32 1e-05, %v1888_v7  ;;  %v1886_v42 = vsub.f32 %v1862_v14, %v1875_v41 }
 0x3a9   : > { %v1877_v43 = vpop.permute.xlu1 %1876 }
 0x3aa   : > { %2575 = vrsqrt.f32 %v1892_v47  ;;  %v1890_v48 = vadd.f32 1e-05, %v1886_v42  ;;  %v1887_v53 = vsub.f32 %v1863_v35, %v1877_v43 }
 0x3ac   : > { %v1891_v45 = vadd.f32 1e-05, %v1887_v53  ;;  %2577 = vrsqrt.f32 %v1890_v48 }
 0x3ae   : > { %2579 = vrsqrt.f32 %v1891_v45 }
 0x3b5   : > { %v2574_v51 = vpop.eup %2573 }
 0x3b6   : > { %v1901_v50 = vsel %vm1755_vm13, %v1865_v52, %v2574_v51 }
 0x3b7   : > { %v2576_v57 = vpop.eup %2575  ;;  %2453 = vmatprep.subr.mxu0 %v1901_v50  ;;  %2467 = vmatprep.subr.mxu1 %v1901_v50 }
 0x3b8   : > { %2454 = vmatpush3.msra.mxu0 %v1901_v50  ;;  %2471 = vmatpush3.msra.mxu1 %v1901_v50  ;;  %v1900_v32 = vsel %vm1755_vm13, %v1864_v2, %v2576_v57 }
 0x3b9   : > { %2455 = vmatprep.subr.mxu0 %v1900_v32  ;;  %2468 = vmatprep.subr.mxu1 %v1900_v32  ;;  %v2578_v33 = vpop.eup %2577 }
 0x3ba   : > { %2456 = vmatpush3.msra.mxu0 %v1900_v32  ;;  %2472 = vmatpush3.msra.mxu1 %v1900_v32  ;;  %v1898_v27 = vsel %vm1755_vm13, %v1862_v14, %v2578_v33  ;;  %v2660_v14 = vmov 2  }
 0x3bb   : > { %v2580_v58 = vpop.eup %2579 }
 0x3bc   : > { %v1899_v25 = vsel %vm1755_vm13, %v1863_v35, %v2580_v58 }
 0x3bd   : > { %2457 = vmatprep.subr.mxu0 %v1899_v25  ;;  %2469 = vmatprep.subr.mxu1 %v1899_v25 }
 0x3be   : > { %2458 = vmatpush3.msra.mxu0 %v1899_v25  ;;  %2473 = vmatpush3.msra.mxu1 %v1899_v25 }
 0x3bf   : > { %2459 = vmatprep.subr.mxu0 %v1898_v27  ;;  %2470 = vmatprep.subr.mxu1 %v1898_v27 }
 0x3c0   : > { %2460 = vmatpush3.msra.mxu0 %v1898_v27  ;;  %2474 = vmatpush3.msra.mxu1 %v1898_v27 }
 0x3c1   : > { %2462 = vmatmul.mubr.msk.f32.vlgmr.msra.gmra.mxu0 %vm1703_vm11, %v1903_v38  ;;  %2465 = vmatmul.mubr.msk.f32.vlgmr.msra.gmra.mxu1 %vm1703_vm11, %v1905_v61 }
 0x481   : > { %v2463_v9 = vpop.f32.mrf.mxu0  ;;  %v2466_v8 = vpop.f32.mrf.mxu1 }
 0x482   : > { %v2004_v12 = vmul.f32 %v2581_v11, %v2463_v9  ;;  %v2006_v0 = vmul.f32 %v2583_v22, %v2466_v8 }
 0x483   : > { %v1984_v17 = vpop.f32.mrf.mxu0  ;;  %v1994_v23 = vpop.f32.mrf.mxu1 }
 0x484   : > { %v2003_v21 = vmul.f32 %v2582_v18, %v1984_v17  ;;  %2013 = vrot.lane.b32.xlu0 %v2004_v12, %s2649_s12  ;;  %v2005_v26 = vmul.f32 %v2584_v24, %v1994_v23 }
 0x486   : > { %2011 = vrot.lane.b32.xlu1 %v2003_v21, %s2649_s12 }
 0x488   : > { %2017 = vrot.lane.b32.xlu0 %v2006_v0, %s2649_s12 }
 0x48a   : > { %2015 = vrot.lane.b32.xlu1 %v2005_v26, %s2649_s12  ;;  %s215_s12 = sand.u32 1, %s2637_s19  }
 0x48b   : > { %s2484_s13 = smul.u32 96, %s215_s12  ;;  %s3389_s25 = scalar_lea.sflag [#allocation3], %s215_s12 }
 0x48d   : > { %s3360_s14 = scalar_lea.vmem [#allocation2], %s2484_s13 }
 0x48e   : > { %s2169_s16 = sshll.u32 %s3360_s14, 4  ;;  %s3376_s16 = int_to_ptr.vmem [resolvable:$true] %s2169_s16 }
 0x48f   : > { %s2585_s26 = scalar_lea.vmem %s3376_s16, 1536  ;;  %p2592_p0 = scmp.lt.s32.totalorder %s3376_s16, %s2590_s6 }
 0x490   : > { %p2586_p11 = scmp.ne.s32.totalorder %s3376_s16, %s2585_s26  ;;  %p2593_p1 = scmp.lt.s32.totalorder %s2591_s7, %s2585_s26 }
 0x492   : > { %p2587_p12 = pnand %p2586_p11, %p2732_p5  ;;  %p2594_p2 = por %p2593_p1, %p2592_p0 }
 0x494   : > { %p2588_p13 = pneg %p2587_p12 }
 0x496   : > { %p2595_p3 = pnand %p2594_p2, %p2588_p13 }
 0x4f6   : > { %v2014_v56 = vpop.permute.xlu0 %2013 }
 0x4f7   : > { %v2024_v31 = vmul.f32 %v2463_v9, %v2014_v56 }
 0x4f8   : > { %v2012_v29 = vpop.permute.xlu1 %2011 }
 0x4f9   : > { %v2023_v46 = vmul.f32 %v2012_v29, %v1984_v17  ;;  %2033 = vrot.lane.b32.xlu0 %v2024_v31, %s2659_s11 }
 0x4fa   : > { %v2018_v13 = vpop.permute.xlu0 %2017 }
 0x4fb   : > { %v2026_v62 = vmul.f32 %v2466_v8, %v2018_v13  ;;  %2031 = vrot.lane.b32.xlu1 %v2023_v46, %s2659_s11 }
 0x4fc   : > { %v2016_v52 = vpop.permute.xlu1 %2015 }
 0x4fd   : > { %v2025_v28 = vmul.f32 %v2016_v52, %v1994_v23  ;;  %2037 = vrot.lane.b32.xlu0 %v2026_v62, %s2659_s11 }
 0x4ff   : > { %2035 = vrot.lane.b32.xlu1 %v2025_v28, %s2659_s11 }
 0x501   : > { %2052 = vperm.xlu0 %2551, %v2004_v12  }
 0x503   : > { %2048 = vperm.xlu1 %2550, %v2003_v21  }
 0x505   : > { %2553 = vset.pattern.permute.xlu0 %v2660_v14 }
 0x507   : > { %2056 = vperm.xlu1 %2550, %v2005_v26  }
 0x50b   : > { %2060 = vperm.xlu1 %2550, %v2006_v0  }
 0x50f   : > { %2552 = vset.pattern.permute.xlu1 %v2660_v14 }
 0x56b   : > { %v2034_v2 = vpop.permute.xlu0 %2033 }
 0x56c   : > { %v2044_v19 = vsub.f32 %v2581_v11, %v2034_v2 }
 0x56d   : > { %v2032_v35 = vpop.permute.xlu1 %2031 }
 0x56e   : > { %v2043_v3 = vsub.f32 %v2582_v18, %v2032_v35  ;;  %2082 = vperm.xlu1 %2552, %v2044_v19  }
 0x56f   : > { %v2038_v37 = vpop.permute.xlu0 %2037 }
 0x570   : > { %2077 = vperm.xlu0 %2553, %v2043_v3   ;;  %v2046_v36 = vsub.f32 %v2583_v22, %v2038_v37 }
 0x571   : > { %v2036_v4 = vpop.permute.xlu1 %2035 }
 0x572   : > { %v2045_v5 = vsub.f32 %v2584_v24, %v2036_v4 }
 0x574   : > { %2092 = vperm.xlu0 %2553, %v2046_v36   ;;  %2087 = vperm.xlu1 %2552, %v2045_v5  }
 0x57c   : > { %v2053_v39 = vpop.permute.xlu0 %2052 }
 0x57d   : > { %v2066_v7 = vmul.f32 %v2053_v39, %v3246_v15  ;;  %v2067_v41 = vmul.f32 %v2053_v39, %v3222_v49  ;;  %v2068_v47 = vmul.f32 %v2053_v39, %v3244_v55 }
 0x57e   : > { %v2049_v54 = vpop.permute.xlu1 %2048 }
 0x57f   : > { %v2063_v42 = vmul.f32 %v2049_v54, %v3229_v16  ;;  %v2064_v43 = vmul.f32 %v2049_v54, %v3234_v10  ;;  %v2065_v53 = vmul.f32 %v2049_v54, %v3220_v60 }
 0x582   : > { %v2057_v1 = vpop.permute.xlu1 %2056 }
 0x583   : > { %v2069_v57 = vmul.f32 %v2057_v1, %v3209_v6  ;;  %v2070_v15 = vmul.f32 %v2057_v1, %v3224_v63  ;;  %v2071_v49 = vmul.f32 %v2057_v1, %v3185_v34 }
 0x586   : > { %v2061_v40 = vpop.permute.xlu1 %2060 }
 0x587   : > { %v2072_v55 = vmul.f32 %v2061_v40, %v3249_v20  ;;  %v2073_v25 = vmul.f32 %v2061_v40, %v3261_v30  ;;  %v2074_v27 = vmul.f32 %v2061_v40, %v3203_v44 }
 0x5e9   : > { %v2083_v48 = vpop.permute.xlu1 %2082 }
 0x5ea   : > { %v2098_v45 = vadd.f32 %v2083_v48, %v2066_v7  ;;  %v2099_v51 = vadd.f32 %v2083_v48, %v2067_v41  ;;  %v2100_v50 = vadd.f32 %v2083_v48, %v2068_v47 }
 0x5eb   : > { %v2078_v32 = vpop.permute.xlu0 %2077 }
 0x5ec   : > { %vm2110_vm14 = vcmp.ge.f32.partialorder %v2098_v45, 0.0  ;;  %vm2111_vm15 = vcmp.ge.f32.partialorder %v2099_v51, 0.0  ;;  %vm2112_vm0 = vcmp.ge.f32.partialorder %v2100_v50, 0.0  ;;  %v2122_v16 = vmul.f32 0.2, %v2098_v45 }
 0x5ed   : > { %v2123_v10 = vmul.f32 0.2, %v2099_v51  ;;  %v2124_v33 = vmul.f32 0.2, %v2100_v50  ;;  %v2095_v58 = vadd.f32 %v2078_v32, %v2063_v42  ;;  %v2096_v60 = vadd.f32 %v2078_v32, %v2064_v43 }
 0x5ee   : > { %v2134_v6 = vsel %vm2110_vm14, %v2098_v45, %v2122_v16  ;;  %v2097_v38 = vadd.f32 %v2078_v32, %v2065_v53 }
 0x5ef   : > { %v2135_v63 = vsel %vm2111_vm15, %v2099_v51, %v2123_v10  ;;  %v2136_v61 = vsel %vm2112_vm0, %v2100_v50, %v2124_v33  ;;  %2146 = vst [vmem:[%s3360_s14 + $0x18] sm:$0xff] %v2134_v6  ;;  %vm2107_vm1 = vcmp.ge.f32.partialorder %v2095_v58, 0.0  ;;  %vm2108_vm2 = vcmp.ge.f32.partialorder %v2096_v60, 0.0  ;;  %v2093_v34 = vpop.permute.xlu0 %2092  ;;  %v2088_v20 = vpop.permute.xlu1 %2087 }
 0x5f0   : > { %2147 = vst [vmem:[%s3360_s14 + $0x20] sm:$0xff] %v2135_v63  ;;  %2148 = vst.msk [vmem:[%s3360_s14 + $0x28] sm:$0xff] %vm1703_vm11, %v2136_v61  ;;  %vm2109_vm3 = vcmp.ge.f32.partialorder %v2097_v38, 0.0  ;;  %v2119_v44 = vmul.f32 0.2, %v2095_v58  ;;  %v2104_v59 = vadd.f32 %v2093_v34, %v2072_v55  ;;  %v2105_v8 = vadd.f32 %v2093_v34, %v2073_v25 }
 0x5f1   : > { %v2120_v30 = vmul.f32 0.2, %v2096_v60  ;;  %v2121_v9 = vmul.f32 0.2, %v2097_v38  ;;  %v2106_v11 = vadd.f32 %v2093_v34, %v2074_v27  ;;  %v2101_v12 = vadd.f32 %v2088_v20, %v2069_v57 }
 0x5f2   : > { %v2131_v17 = vsel %vm2107_vm1, %v2095_v58, %v2119_v44  ;;  %vm2116_vm4 = vcmp.ge.f32.partialorder %v2104_v59, 0.0  ;;  %v2128_v21 = vmul.f32 0.2, %v2104_v59  ;;  %vm2117_vm5 = vcmp.ge.f32.partialorder %v2105_v8, 0.0 }
 0x5f3   : > { %v2132_v18 = vsel %vm2108_vm2, %v2096_v60, %v2120_v30  ;;  %v2133_v22 = vsel %vm2109_vm3, %v2097_v38, %v2121_v9  ;;  %2143 = vst [vmem:[%s3360_s14] sm:$0xff] %v2131_v17  ;;  %vm2118_vm6 = vcmp.ge.f32.partialorder %v2106_v11, 0.0  ;;  %v2129_v0 = vmul.f32 0.2, %v2105_v8 }
 0x5f4   : > { %2144 = vst [vmem:[%s3360_s14 + $0x8] sm:$0xff] %v2132_v18  ;;  %2145 = vst.msk [vmem:[%s3360_s14 + $0x10] sm:$0xff] %vm1703_vm11, %v2133_v22  ;;  %v2130_v23 = vmul.f32 0.2, %v2106_v11  ;;  %v2140_v24 = vsel %vm2116_vm4, %v2104_v59, %v2128_v21  ;;  %v2102_v26 = vadd.f32 %v2088_v20, %v2070_v15  ;;  %v2103_v56 = vadd.f32 %v2088_v20, %v2071_v49 }
 0x5f5   : > { %v2141_v31 = vsel %vm2117_vm5, %v2105_v8, %v2129_v0  ;;  %2152 = vst [vmem:[%s3360_s14 + $0x48] sm:$0xff] %v2140_v24  ;;  %vm2113_vm7 = vcmp.ge.f32.partialorder %v2101_v12, 0.0  ;;  %v2125_v29 = vmul.f32 0.2, %v2101_v12 }
 0x5f6   : > { %v2142_v46 = vsel %vm2118_vm6, %v2106_v11, %v2130_v23  ;;  %2153 = vst [vmem:[%s3360_s14 + $0x50] sm:$0xff] %v2141_v31  ;;  %vm2114_vm8 = vcmp.ge.f32.partialorder %v2102_v26, 0.0  ;;  %vm2115_vm9 = vcmp.ge.f32.partialorder %v2103_v56, 0.0  ;;  %v2126_v13 = vmul.f32 0.2, %v2102_v26 }
 0x5f7   : > { %2154 = vst.msk [vmem:[%s3360_s14 + $0x58] sm:$0xff] %vm1703_vm11, %v2142_v46  ;;  %v2127_v62 = vmul.f32 0.2, %v2103_v56  ;;  %v2137_v52 = vsel %vm2113_vm7, %v2101_v12, %v2125_v29 }
 0x5f8   : > { %v2138_v28 = vsel %vm2114_vm8, %v2102_v26, %v2126_v13  ;;  %2149 = vst [vmem:[%s3360_s14 + $0x30] sm:$0xff] %v2137_v52 }
 0x5f9   : > { %v2139_v14 = vsel %vm2115_vm9, %v2103_v56, %v2127_v62  ;;  %2150 = vst [vmem:[%s3360_s14 + $0x38] sm:$0xff] %v2138_v28 }
 0x5fa   : > { %2151 = vst.msk [vmem:[%s3360_s14 + $0x40] sm:$0xff] %vm1703_vm11, %v2139_v14 }
 0x5fb   : > { %2598 = shalt.err (!%p2595_p3)
}
 0x5fc   : > { %s2599_s8 = scalar_lea.hbm %s3382_s23, 1536  ;;  %s2603_s11 = scalar_lea.hbm %s3434_s5, 3072 }
 0x5fd   : > { %p2600_p4 = scmp.ne.s32.totalorder %s3382_s23, %s2599_s8  ;;  %p2604_p9 = scmp.lt.s32.totalorder %s3382_s23, %s3434_s5 }
 0x5fe   : > { %p2605_p10 = scmp.lt.s32.totalorder %s2603_s11, %s2599_s8 }
 0x5ff   : > { %p2601_p7 = pnand %p2600_p4, %p2732_p5 }
 0x600   : > { %p2606_p11 = por %p2605_p10, %p2604_p9 }
 0x601   : > { %p2602_p8 = pneg %p2601_p7 }
 0x603   : > { %p2607_p12 = pnand %p2606_p11, %p2602_p8 }
 0x605   : > { %2610 = shalt.err (!%p2607_p12)
}
 0x606   : > { %s2662_s14 = smov 384   ;;  %s2663_s15 = smov 24  }
 0x607   : > { %2493 = dma.vmem_to_hbm [thread:$0]  (%p2732_p5), %s3376_s16, 1536, %s3382_s23, %s3389_s25, %s2662_s14, %s2662_s14, %s2663_s15  }
 0x608 PF: > { %p2499_p13 = scmp.ge.s32.totalorder %s2645_s21, 2  ;;  %s2184_s22 = sand.u32 1, %s2633_s18  }
 0x609   : > { %s2185_s17 = scalar_lea.sflag [#allocation3], %s2184_s22 }
 0x60a   : > { %p2496_p0 = pnand %p2499_p13, %p2736_p6 }
 0x60c   : > { %p2497_p1 = pneg %p2496_p0 }
 0x60e   : > { %2628 = dma.done.wait (%p2497_p1), %s2185_s17, 1536  }
 0x60f   : > { %2630 = vsyncadd (%p2497_p1), %s2185_s17, 4294965760  ;;  %p15_p2 = scmp.ge.s32.totalorder %s2719_s24, 4   ;;  %s3489_s18 = smov %s2637_s19 }
 0x610   : > { %s3490_s19 = smov %s2641_s20  ;;  %s3491_s20 = smov %s2730_s27 }
 0x611   : > { %s3492_s21 = smov %s2719_s24  ;;  %17 = sbr.rel (!%p15_p2) target bundleno = 3 (0x3), region = 83 }
 0x616   :  { %2190 = vsyncpa [#allocation3], 1 }
 0x617   :  { %2192 = vsyncpa [#allocation3 + $0x1], 1 }

</bundles_post_ra>
